<compile_context>
chip_gen: v5e
topology: v5e:2x2
jax: 0.10.0
libtpu: 0.0.40
codegen_flags: <defaults>
</compile_context>

<pallas_src>
import math
import jax
import jax.numpy as jnp
from jax.experimental import pallas as pl
from jax.experimental.pallas import tpu as pltpu

D_MODEL = 32
NUM_HEADS = 4
D_K = D_MODEL // NUM_HEADS          # 8
D_FF = 64
EPS = 1e-5                          # nn.LayerNorm default eps
NEG_INF = -1e9

# --- row offsets inside the packed parameter slabs (all multiples of 8) ------
QKV_SELF = 0        # wqkv rows  0..32 : [Wq*s | Wk | Wv ; bq*s | bk | bv]  self
QKV_CROSS = 40      # wqkv rows 40..72 : same layout, cross attention
MISC_OUT = 0        # wmisc rows  0..32 : [self_Wo | cross_Wo], row 32 = biases
MISC_FFN1 = 40      # wmisc rows 40..72 : fc1 (D x D_FF), row 72 = bias
MISC_FFN2 = 80      # wmisc rows 80..144: fc2 (D_FF x D), row 144 = bias
MISC_LN = 152       # wmisc rows 152..157: gamma1, gamma2, gamma3, beta1, beta2, beta3


def make_decoder_kernel(B, S):
    """Kernel factory; B, S are static (closed over)."""
    N = B * S

    def kernel(xe_ref, bias_ref, wqkv_ref, wmisc_ref, o_ref):
        xe = xe_ref[...]                    # (2N, D): rows 0:N = x, N:2N = encoder out
        x = xe[:N, :]
        enc = xe[N:, :]
        bias_self = bias_ref[:N, :]         # (N, N) additive mask (0 / -1e9)
        bias_cross = bias_ref[N:, :]        # (N, N)
        wqkv = wqkv_ref[...]                # (80, 96)
        wmisc = wmisc_ref[...]              # (160, 96)

        # static, sublane-aligned slices of the packed parameter slabs
        self_qkv_w = wqkv[QKV_SELF:QKV_SELF + D_MODEL, :]                         # (D, 3D)
        self_qkv_b = wqkv[QKV_SELF + D_MODEL:QKV_SELF + D_MODEL + 1, :]           # (1, 3D)
        cross_qkv_w = wqkv[QKV_CROSS:QKV_CROSS + D_MODEL, :]
        cross_qkv_b = wqkv[QKV_CROSS + D_MODEL:QKV_CROSS + D_MODEL + 1, :]

        self_o_w = wmisc[MISC_OUT:MISC_OUT + D_MODEL, 0:D_MODEL]
        self_o_b = wmisc[MISC_OUT + D_MODEL:MISC_OUT + D_MODEL + 1, 0:D_MODEL]
        cross_o_w = wmisc[MISC_OUT:MISC_OUT + D_MODEL, D_MODEL:2 * D_MODEL]
        cross_o_b = wmisc[MISC_OUT + D_MODEL:MISC_OUT + D_MODEL + 1, D_MODEL:2 * D_MODEL]
        f1_w = wmisc[MISC_FFN1:MISC_FFN1 + D_MODEL, 0:D_FF]
        f1_b = wmisc[MISC_FFN1 + D_MODEL:MISC_FFN1 + D_MODEL + 1, 0:D_FF]
        f2_w = wmisc[MISC_FFN2:MISC_FFN2 + D_FF, 0:D_MODEL]
        f2_b = wmisc[MISC_FFN2 + D_FF:MISC_FFN2 + D_FF + 1, 0:D_MODEL]
        ln = wmisc[MISC_LN:MISC_LN + 6, 0:D_MODEL]                                 # (6, D)

        def layernorm(v, idx):
            g = ln[idx:idx + 1, :]          # (1, D) gamma
            b = ln[idx + 3:idx + 4, :]      # (1, D) beta
            mean = jnp.mean(v, axis=-1, keepdims=True)
            c = v - mean
            var = jnp.mean(c * c, axis=-1, keepdims=True)
            return c * jax.lax.rsqrt(var + EPS) * g + b

        def mha(q, k, v, bias, wo, bo):
            # q, k, v: (N, D) flat over batch; q already carries 1/sqrt(d_k).
            # bias: (N, N), -1e9 on masked and cross-batch pairs (softmax -> 0).
            heads = []
            for h in range(NUM_HEADS):                      # static 4-way loop
                sl = slice(h * D_K, (h + 1) * D_K)
                s = jax.lax.dot_general(
                    q[:, sl], k[:, sl], (((1,), (1,)), ((), ())),
                    preferred_element_type=jnp.float32) + bias          # (N, N)
                m = jnp.max(s, axis=-1, keepdims=True)
                e = jnp.exp(s - m)
                # approx=False keeps the 1e-4 tolerance; flip to True if relaxed.
                p = e * pl.reciprocal(jnp.sum(e, axis=-1, keepdims=True))
                heads.append(jnp.dot(p, v[:, sl],
                                     preferred_element_type=jnp.float32))  # (N, D_K)
            ctx = jnp.concatenate(heads, axis=-1)           # (N, D), no scratch round-trip
            return jnp.dot(ctx, wo, preferred_element_type=jnp.float32) + bo

        # ---- self attention: one fused (N, 3D) QKV projection ----
        qkv = jnp.dot(x, self_qkv_w, preferred_element_type=jnp.float32) + self_qkv_b
        sa = mha(qkv[:, 0:D_MODEL],
                 qkv[:, D_MODEL:2 * D_MODEL],
                 qkv[:, 2 * D_MODEL:3 * D_MODEL],
                 bias_self, self_o_w, self_o_b)
        x1 = layernorm(x + sa, 0)                           # dropout == identity

        # ---- cross attention: single fused projection over [x1; enc] (2N rows) ----
        xq_kv = jnp.concatenate([x1, enc], axis=0)          # (2N, D)
        proj = jnp.dot(xq_kv, cross_qkv_w, preferred_element_type=jnp.float32) + cross_qkv_b
        ca = mha(proj[:N, 0:D_MODEL],                       # Q from x1 rows
                 proj[N:, D_MODEL:2 * D_MODEL],             # K from enc rows
                 proj[N:, 2 * D_MODEL:3 * D_MODEL],         # V from enc rows
                 bias_cross, cross_o_w, cross_o_b)
        x2 = layernorm(x1 + ca, 1)

        # ---- position-wise feed forward ----
        h1 = jnp.maximum(jnp.dot(x2, f1_w, preferred_element_type=jnp.float32) + f1_b, 0.0)
        ff = jnp.dot(h1, f2_w, preferred_element_type=jnp.float32) + f2_b
        x3 = layernorm(x2 + ff, 2)

        o_ref[...] = x3.astype(o_ref.dtype)

    return kernel


# ---------------------------------------------------------------------------
# Host-side packing: fused/pre-scaled parameter slabs and the combined mask bias.
# ---------------------------------------------------------------------------
def _pad(a, rows, cols):
    return jnp.pad(a, ((0, rows - a.shape[0]), (0, cols - a.shape[1])))


def pack_params(params):
    (sqw, sqb, skw, skb, svw, svb, sow, sob,
     cqw, cqb, ckw, ckb, cvw, cvb, cow, cob,
     f1w, f1b, f2w, f2b, g1, be1, g2, be2, g3, be3) = params
    scale = 1.0 / math.sqrt(D_K)

    def wb(w, b):                                   # [W; b] row-stacked -> (din+1, dout)
        return jnp.concatenate([w, b], axis=0)

    self_qkv = jnp.concatenate([wb(sqw * scale, sqb * scale),
                                wb(skw, skb), wb(svw, svb)], axis=1)       # (33, 96)
    cross_qkv = jnp.concatenate([wb(cqw * scale, cqb * scale),
                                 wb(ckw, ckb), wb(cvw, cvb)], axis=1)      # (33, 96)
    wqkv = jnp.concatenate([_pad(self_qkv, 40, 96),
                            _pad(cross_qkv, 40, 96)], axis=0)              # (80, 96)

    outproj = jnp.concatenate([wb(sow, sob), wb(cow, cob)], axis=1)        # (33, 64)
    ffn1 = wb(f1w, f1b)                                                    # (33, 64)
    ffn2 = wb(f2w, f2b)                                                    # (65, 32)
    lnp = jnp.concatenate([g1, g2, g3, be1, be2, be3], axis=0)             # (6, 32)
    wmisc = jnp.concatenate([_pad(outproj, 40, 96), _pad(ffn1, 40, 96),
                             _pad(ffn2, 72, 96), _pad(lnp, 8, 96)], axis=0)  # (160, 96)
    return wqkv, wmisc


def build_mask_bias(tgt_mask, src_mask, B, S):
    """Combined (2N, N) additive bias: rows 0:N self-attn, N:2N cross-attn.
    -1e9 on masked and cross-batch pairs; 0 elsewhere."""
    bid = jnp.repeat(jnp.arange(B), S)                      # (N,)
    same = bid[:, None] == bid[None, :]                     # (N, N) same-batch

    def bias(mask):
        allow = same & (jnp.tile(mask, (B, B)) != 0.0)      # positional mask at (i%S, j%S)
        return jnp.where(allow, 0.0, NEG_INF).astype(jnp.float32)

    return jnp.concatenate([bias(tgt_mask), bias(src_mask)], axis=0)


def decoder_layer(x, enc, tgt_mask, src_mask, wqkv, wmisc):
    B, S, D = x.shape
    N = B * S
    xe = jnp.concatenate([x.reshape(N, D), enc.reshape(N, D)], axis=0)     # (2N, D)
    bias = build_mask_bias(tgt_mask, src_mask, B, S)                       # (2N, N)

    vmem = pl.BlockSpec(memory_space=pltpu.MemorySpace.VMEM)
    out = pl.pallas_call(
        make_decoder_kernel(B, S),
        out_shape=jax.ShapeDtypeStruct((N, D), jnp.float32),
        in_specs=[vmem, vmem, vmem, vmem],
        out_specs=vmem,
    )(xe, bias, wqkv, wmisc)
    return out.reshape(B, S, D)


# ---------------------------------------------------------------------------
# Raw (PyTorch-equivalent) parameters and a pure-JAX reference for correctness.
# ---------------------------------------------------------------------------
def init_params(key):
    keys = jax.random.split(key, 20)
    it = iter(keys)

    def linear(din, dout):
        w = jax.random.normal(next(it), (din, dout), jnp.float32) * (1.0 / math.sqrt(din))
        b = jax.random.normal(next(it), (1, dout), jnp.float32) * 0.02
        return w, b

    sqw, sqb = linear(D_MODEL, D_MODEL)   # self attention q/k/v/o
    skw, skb = linear(D_MODEL, D_MODEL)
    svw, svb = linear(D_MODEL, D_MODEL)
    sow, sob = linear(D_MODEL, D_MODEL)
    cqw, cqb = linear(D_MODEL, D_MODEL)   # cross attention q/k/v/o
    ckw, ckb = linear(D_MODEL, D_MODEL)
    cvw, cvb = linear(D_MODEL, D_MODEL)
    cow, cob = linear(D_MODEL, D_MODEL)
    f1w, f1b = linear(D_MODEL, D_FF)      # feed forward
    f2w, f2b = linear(D_FF, D_MODEL)
    g1 = jnp.ones((1, D_MODEL), jnp.float32); be1 = jnp.zeros((1, D_MODEL), jnp.float32)
    g2 = jnp.ones((1, D_MODEL), jnp.float32); be2 = jnp.zeros((1, D_MODEL), jnp.float32)
    g3 = jnp.ones((1, D_MODEL), jnp.float32); be3 = jnp.zeros((1, D_MODEL), jnp.float32)

    return (sqw, sqb, skw, skb, svw, svb, sow, sob,
            cqw, cqb, ckw, ckb, cvw, cvb, cow, cob,
            f1w, f1b, f2w, f2b,
            g1, be1, g2, be2, g3, be3)


def ref_forward(x, enc, tgt_mask, src_mask, params):
    """Pure-JAX reference mirroring the PyTorch forward."""
    (sqw, sqb, skw, skb, svw, svb, sow, sob,
     cqw, cqb, ckw, ckb, cvw, cvb, cow, cob,
     f1w, f1b, f2w, f2b, g1, be1, g2, be2, g3, be3) = params

    def mha(q_in, kv_in, mask, wq, bq, wk, bk, wv, bv, wo, bo):
        B, S, D = q_in.shape
        Q = (q_in @ wq + bq).reshape(B, S, NUM_HEADS, D_K).transpose(0, 2, 1, 3)
        K = (kv_in @ wk + bk).reshape(B, -1, NUM_HEADS, D_K).transpose(0, 2, 1, 3)
        V = (kv_in @ wv + bv).reshape(B, -1, NUM_HEADS, D_K).transpose(0, 2, 1, 3)
        scores = jnp.einsum('bhqd,bhkd->bhqk', Q, K) / math.sqrt(D_K)
        scores = jnp.where(mask == 0.0, NEG_INF, scores)
        probs = jax.nn.softmax(scores, axis=-1)
        out = jnp.einsum('bhqk,bhkd->bhqd', probs, V).transpose(0, 2, 1, 3).reshape(B, S, D)
        return out @ wo + bo

    def ln(v, g, b):
        m = v.mean(-1, keepdims=True)
        var = ((v - m) ** 2).mean(-1, keepdims=True)
        return (v - m) / jnp.sqrt(var + EPS) * g + b

    x = ln(x + mha(x, x, tgt_mask, sqw, sqb, skw, skb, svw, svb, sow, sob), g1, be1)
    x = ln(x + mha(x, enc, src_mask, cqw, cqb, ckw, ckb, cvw, cvb, cow, cob), g2, be2)
    ff = jnp.maximum(x @ f1w + f1b, 0.0) @ f2w + f2b
    x = ln(x + ff, g3, be3)
    return x


if __name__ == "__main__":
    key = jax.random.PRNGKey(0)
    B, S = 2, 8
    kx, ke, kp = jax.random.split(key, 3)
    x = jax.random.normal(kx, (B, S, D_MODEL), jnp.float32)
    enc = jax.random.normal(ke, (B, S, D_MODEL), jnp.float32)
    tgt_mask = jnp.tril(jnp.ones((S, S), jnp.float32))   # causal mask (self-attn)
    src_mask = jnp.ones((S, S), jnp.float32)             # full visibility (cross-attn)

    raw_params = init_params(kp)
    wqkv, wmisc = pack_params(raw_params)

    out = decoder_layer(x, enc, tgt_mask, src_mask, wqkv, wmisc)
    out = jax.block_until_ready(out)

    # Reference at true-f32 matmul precision (kernel dots are f32 on the MXU).
    with jax.default_matmul_precision("highest"):
        ref = ref_forward(x, enc, tgt_mask, src_mask, raw_params)
        ref = jax.block_until_ready(ref)

    assert out.shape == (B, S, D_MODEL)
    max_err = float(jnp.max(jnp.abs(out - ref)))
    assert jnp.allclose(out, ref, atol=1e-4, rtol=1e-4), f"max_err={max_err}"
    print("KERNEL_OK")
</pallas_src>

<mosaic_0001>
module attributes {stable_mosaic.version = 11 : i64} {
  func.func @kernel(%arg0: memref<32x32xf32, #tpu.memory_space<vmem>>, %arg1: memref<32x16xf32, #tpu.memory_space<vmem>>, %arg2: memref<80x96xf32, #tpu.memory_space<vmem>>, %arg3: memref<160x96xf32, #tpu.memory_space<vmem>>, %arg4: memref<16x32xf32, #tpu.memory_space<vmem>>) attributes {dimension_semantics = [], scalar_prefetch = 0 : i64, scratch_operands = 0 : i64, tpu.core_type = #tpu.core_type<tc>} {
    %c0 = arith.constant 0 : index
    %c0_0 = arith.constant 0 : index
    %0 = vector.load %arg0[%c0, %c0_0] : memref<32x32xf32, #tpu.memory_space<vmem>>, vector<32x32xf32>
    %1 = vector.extract_strided_slice %0 {offsets = [0, 0], sizes = [16, 32], strides = [1, 1]} : vector<32x32xf32> to vector<16x32xf32>
    %2 = vector.extract_strided_slice %0 {offsets = [16, 0], sizes = [16, 32], strides = [1, 1]} : vector<32x32xf32> to vector<16x32xf32>
    %c0_1 = arith.constant 0 : index
    %c0_2 = arith.constant 0 : index
    %3 = vector.load %arg1[%c0_1, %c0_2] : memref<32x16xf32, #tpu.memory_space<vmem>>, vector<16x16xf32>
    %c16 = arith.constant 16 : index
    %c0_3 = arith.constant 0 : index
    %4 = vector.load %arg1[%c16, %c0_3] : memref<32x16xf32, #tpu.memory_space<vmem>>, vector<16x16xf32>
    %c0_4 = arith.constant 0 : index
    %c0_5 = arith.constant 0 : index
    %5 = vector.load %arg2[%c0_4, %c0_5] : memref<80x96xf32, #tpu.memory_space<vmem>>, vector<80x96xf32>
    %c0_6 = arith.constant 0 : index
    %c0_7 = arith.constant 0 : index
    %6 = vector.load %arg3[%c0_6, %c0_7] : memref<160x96xf32, #tpu.memory_space<vmem>>, vector<160x96xf32>
    %7 = vector.extract_strided_slice %5 {offsets = [0, 0], sizes = [32, 96], strides = [1, 1]} : vector<80x96xf32> to vector<32x96xf32>
    %8 = vector.extract_strided_slice %5 {offsets = [32, 0], sizes = [1, 96], strides = [1, 1]} : vector<80x96xf32> to vector<1x96xf32>
    %9 = vector.extract_strided_slice %5 {offsets = [40, 0], sizes = [32, 96], strides = [1, 1]} : vector<80x96xf32> to vector<32x96xf32>
    %10 = vector.extract_strided_slice %5 {offsets = [72, 0], sizes = [1, 96], strides = [1, 1]} : vector<80x96xf32> to vector<1x96xf32>
    %11 = vector.extract_strided_slice %6 {offsets = [0, 0], sizes = [32, 32], strides = [1, 1]} : vector<160x96xf32> to vector<32x32xf32>
    %12 = vector.extract_strided_slice %6 {offsets = [32, 0], sizes = [1, 32], strides = [1, 1]} : vector<160x96xf32> to vector<1x32xf32>
    %13 = vector.extract_strided_slice %6 {offsets = [0, 32], sizes = [32, 32], strides = [1, 1]} : vector<160x96xf32> to vector<32x32xf32>
    %14 = vector.extract_strided_slice %6 {offsets = [32, 32], sizes = [1, 32], strides = [1, 1]} : vector<160x96xf32> to vector<1x32xf32>
    %15 = vector.extract_strided_slice %6 {offsets = [40, 0], sizes = [32, 64], strides = [1, 1]} : vector<160x96xf32> to vector<32x64xf32>
    %16 = vector.extract_strided_slice %6 {offsets = [72, 0], sizes = [1, 64], strides = [1, 1]} : vector<160x96xf32> to vector<1x64xf32>
    %17 = vector.extract_strided_slice %6 {offsets = [80, 0], sizes = [64, 32], strides = [1, 1]} : vector<160x96xf32> to vector<64x32xf32>
    %18 = vector.extract_strided_slice %6 {offsets = [144, 0], sizes = [1, 32], strides = [1, 1]} : vector<160x96xf32> to vector<1x32xf32>
    %19 = vector.extract_strided_slice %6 {offsets = [152, 0], sizes = [6, 32], strides = [1, 1]} : vector<160x96xf32> to vector<6x32xf32>
    %cst = arith.constant dense<0.000000e+00> : vector<16x96xf32>
    %20 = tpu.matmul %1, %7, %cst {dimension_numbers = #tpu.dot_dimension_numbers<[1], [0], [0], [1], [0, 0, 1, 1], [], []>} : vector<16x32xf32>, vector<32x96xf32>, vector<16x96xf32> -> vector<16x96xf32>
    %21 = vector.broadcast %8 : vector<1x96xf32> to vector<16x96xf32>
    %22 = arith.addf %20, %21 : vector<16x96xf32>
    %23 = vector.extract_strided_slice %22 {offsets = [0, 0], sizes = [16, 32], strides = [1, 1]} : vector<16x96xf32> to vector<16x32xf32>
    %24 = vector.extract_strided_slice %22 {offsets = [0, 32], sizes = [16, 32], strides = [1, 1]} : vector<16x96xf32> to vector<16x32xf32>
    %25 = vector.extract_strided_slice %22 {offsets = [0, 64], sizes = [16, 32], strides = [1, 1]} : vector<16x96xf32> to vector<16x32xf32>
    %26 = vector.extract_strided_slice %23 {offsets = [0, 0], sizes = [16, 8], strides = [1, 1]} : vector<16x32xf32> to vector<16x8xf32>
    %27 = vector.extract_strided_slice %24 {offsets = [0, 0], sizes = [16, 8], strides = [1, 1]} : vector<16x32xf32> to vector<16x8xf32>
    %cst_8 = arith.constant dense<0.000000e+00> : vector<16x16xf32>
    %28 = tpu.matmul %26, %27, %cst_8 {dimension_numbers = #tpu.dot_dimension_numbers<[1], [1], [0], [0], [0, 0, 1, 0], [], []>} : vector<16x8xf32>, vector<16x8xf32>, vector<16x16xf32> -> vector<16x16xf32>
    %29 = arith.addf %28, %3 : vector<16x16xf32>
    %cst_9 = arith.constant dense<0xFF800000> : vector<16xf32>
    %30 = vector.multi_reduction <maximumf>, %29, %cst_9 [1] : vector<16x16xf32> to vector<16xf32>
    %31 = vector.shape_cast %30 : vector<16xf32> to vector<16x1xf32>
    %32 = vector.broadcast %31 : vector<16x1xf32> to vector<16x16xf32>
    %33 = arith.subf %29, %32 : vector<16x16xf32>
    %34 = math.exp %33 : vector<16x16xf32>
    %cst_10 = arith.constant dense<0.000000e+00> : vector<16xf32>
    %35 = vector.multi_reduction <add>, %34, %cst_10 [1] : vector<16x16xf32> to vector<16xf32>
    %36 = vector.shape_cast %35 : vector<16xf32> to vector<16x1xf32>
    %37 = tpu.reciprocal %36 : vector<16x1xf32> -> vector<16x1xf32>
    %38 = vector.broadcast %37 : vector<16x1xf32> to vector<16x16xf32>
    %39 = arith.mulf %34, %38 : vector<16x16xf32>
    %40 = vector.extract_strided_slice %25 {offsets = [0, 0], sizes = [16, 8], strides = [1, 1]} : vector<16x32xf32> to vector<16x8xf32>
    %cst_11 = arith.constant dense<0.000000e+00> : vector<16x8xf32>
    %41 = tpu.matmul %39, %40, %cst_11 {dimension_numbers = #tpu.dot_dimension_numbers<[1], [0], [0], [1], [0, 0, 1, 1], [], []>} : vector<16x16xf32>, vector<16x8xf32>, vector<16x8xf32> -> vector<16x8xf32>
    %42 = vector.extract_strided_slice %23 {offsets = [0, 8], sizes = [16, 8], strides = [1, 1]} : vector<16x32xf32> to vector<16x8xf32>
    %43 = vector.extract_strided_slice %24 {offsets = [0, 8], sizes = [16, 8], strides = [1, 1]} : vector<16x32xf32> to vector<16x8xf32>
    %cst_12 = arith.constant dense<0.000000e+00> : vector<16x16xf32>
    %44 = tpu.matmul %42, %43, %cst_12 {dimension_numbers = #tpu.dot_dimension_numbers<[1], [1], [0], [0], [0, 0, 1, 0], [], []>} : vector<16x8xf32>, vector<16x8xf32>, vector<16x16xf32> -> vector<16x16xf32>
    %45 = arith.addf %44, %3 : vector<16x16xf32>
    %cst_13 = arith.constant dense<0xFF800000> : vector<16xf32>
    %46 = vector.multi_reduction <maximumf>, %45, %cst_13 [1] : vector<16x16xf32> to vector<16xf32>
    %47 = vector.shape_cast %46 : vector<16xf32> to vector<16x1xf32>
    %48 = vector.broadcast %47 : vector<16x1xf32> to vector<16x16xf32>
    %49 = arith.subf %45, %48 : vector<16x16xf32>
    %50 = math.exp %49 : vector<16x16xf32>
    %cst_14 = arith.constant dense<0.000000e+00> : vector<16xf32>
    %51 = vector.multi_reduction <add>, %50, %cst_14 [1] : vector<16x16xf32> to vector<16xf32>
    %52 = vector.shape_cast %51 : vector<16xf32> to vector<16x1xf32>
    %53 = tpu.reciprocal %52 : vector<16x1xf32> -> vector<16x1xf32>
    %54 = vector.broadcast %53 : vector<16x1xf32> to vector<16x16xf32>
    %55 = arith.mulf %50, %54 : vector<16x16xf32>
    %56 = vector.extract_strided_slice %25 {offsets = [0, 8], sizes = [16, 8], strides = [1, 1]} : vector<16x32xf32> to vector<16x8xf32>
    %cst_15 = arith.constant dense<0.000000e+00> : vector<16x8xf32>
    %57 = tpu.matmul %55, %56, %cst_15 {dimension_numbers = #tpu.dot_dimension_numbers<[1], [0], [0], [1], [0, 0, 1, 1], [], []>} : vector<16x16xf32>, vector<16x8xf32>, vector<16x8xf32> -> vector<16x8xf32>
    %58 = vector.extract_strided_slice %23 {offsets = [0, 16], sizes = [16, 8], strides = [1, 1]} : vector<16x32xf32> to vector<16x8xf32>
    %59 = vector.extract_strided_slice %24 {offsets = [0, 16], sizes = [16, 8], strides = [1, 1]} : vector<16x32xf32> to vector<16x8xf32>
    %cst_16 = arith.constant dense<0.000000e+00> : vector<16x16xf32>
    %60 = tpu.matmul %58, %59, %cst_16 {dimension_numbers = #tpu.dot_dimension_numbers<[1], [1], [0], [0], [0, 0, 1, 0], [], []>} : vector<16x8xf32>, vector<16x8xf32>, vector<16x16xf32> -> vector<16x16xf32>
    %61 = arith.addf %60, %3 : vector<16x16xf32>
    %cst_17 = arith.constant dense<0xFF800000> : vector<16xf32>
    %62 = vector.multi_reduction <maximumf>, %61, %cst_17 [1] : vector<16x16xf32> to vector<16xf32>
    %63 = vector.shape_cast %62 : vector<16xf32> to vector<16x1xf32>
    %64 = vector.broadcast %63 : vector<16x1xf32> to vector<16x16xf32>
    %65 = arith.subf %61, %64 : vector<16x16xf32>
    %66 = math.exp %65 : vector<16x16xf32>
    %cst_18 = arith.constant dense<0.000000e+00> : vector<16xf32>
    %67 = vector.multi_reduction <add>, %66, %cst_18 [1] : vector<16x16xf32> to vector<16xf32>
    %68 = vector.shape_cast %67 : vector<16xf32> to vector<16x1xf32>
    %69 = tpu.reciprocal %68 : vector<16x1xf32> -> vector<16x1xf32>
    %70 = vector.broadcast %69 : vector<16x1xf32> to vector<16x16xf32>
    %71 = arith.mulf %66, %70 : vector<16x16xf32>
    %72 = vector.extract_strided_slice %25 {offsets = [0, 16], sizes = [16, 8], strides = [1, 1]} : vector<16x32xf32> to vector<16x8xf32>
    %cst_19 = arith.constant dense<0.000000e+00> : vector<16x8xf32>
    %73 = tpu.matmul %71, %72, %cst_19 {dimension_numbers = #tpu.dot_dimension_numbers<[1], [0], [0], [1], [0, 0, 1, 1], [], []>} : vector<16x16xf32>, vector<16x8xf32>, vector<16x8xf32> -> vector<16x8xf32>
    %74 = vector.extract_strided_slice %23 {offsets = [0, 24], sizes = [16, 8], strides = [1, 1]} : vector<16x32xf32> to vector<16x8xf32>
    %75 = vector.extract_strided_slice %24 {offsets = [0, 24], sizes = [16, 8], strides = [1, 1]} : vector<16x32xf32> to vector<16x8xf32>
    %cst_20 = arith.constant dense<0.000000e+00> : vector<16x16xf32>
    %76 = tpu.matmul %74, %75, %cst_20 {dimension_numbers = #tpu.dot_dimension_numbers<[1], [1], [0], [0], [0, 0, 1, 0], [], []>} : vector<16x8xf32>, vector<16x8xf32>, vector<16x16xf32> -> vector<16x16xf32>
    %77 = arith.addf %76, %3 : vector<16x16xf32>
    %cst_21 = arith.constant dense<0xFF800000> : vector<16xf32>
    %78 = vector.multi_reduction <maximumf>, %77, %cst_21 [1] : vector<16x16xf32> to vector<16xf32>
    %79 = vector.shape_cast %78 : vector<16xf32> to vector<16x1xf32>
    %80 = vector.broadcast %79 : vector<16x1xf32> to vector<16x16xf32>
    %81 = arith.subf %77, %80 : vector<16x16xf32>
    %82 = math.exp %81 : vector<16x16xf32>
    %cst_22 = arith.constant dense<0.000000e+00> : vector<16xf32>
    %83 = vector.multi_reduction <add>, %82, %cst_22 [1] : vector<16x16xf32> to vector<16xf32>
    %84 = vector.shape_cast %83 : vector<16xf32> to vector<16x1xf32>
    %85 = tpu.reciprocal %84 : vector<16x1xf32> -> vector<16x1xf32>
    %86 = vector.broadcast %85 : vector<16x1xf32> to vector<16x16xf32>
    %87 = arith.mulf %82, %86 : vector<16x16xf32>
    %88 = vector.extract_strided_slice %25 {offsets = [0, 24], sizes = [16, 8], strides = [1, 1]} : vector<16x32xf32> to vector<16x8xf32>
    %cst_23 = arith.constant dense<0.000000e+00> : vector<16x8xf32>
    %89 = tpu.matmul %87, %88, %cst_23 {dimension_numbers = #tpu.dot_dimension_numbers<[1], [0], [0], [1], [0, 0, 1, 1], [], []>} : vector<16x16xf32>, vector<16x8xf32>, vector<16x8xf32> -> vector<16x8xf32>
    %90 = tpu.concatenate %41, %57, %73, %89 in 1 : vector<16x8xf32>, vector<16x8xf32>, vector<16x8xf32>, vector<16x8xf32> -> vector<16x32xf32>
    %cst_24 = arith.constant dense<0.000000e+00> : vector<16x32xf32>
    %91 = tpu.matmul %90, %11, %cst_24 {dimension_numbers = #tpu.dot_dimension_numbers<[1], [0], [0], [1], [0, 0, 1, 1], [], []>} : vector<16x32xf32>, vector<32x32xf32>, vector<16x32xf32> -> vector<16x32xf32>
    %92 = vector.broadcast %12 : vector<1x32xf32> to vector<16x32xf32>
    %93 = arith.addf %91, %92 : vector<16x32xf32>
    %94 = arith.addf %1, %93 : vector<16x32xf32>
    %95 = vector.extract_strided_slice %19 {offsets = [0, 0], sizes = [1, 32], strides = [1, 1]} : vector<6x32xf32> to vector<1x32xf32>
    %96 = vector.extract_strided_slice %19 {offsets = [3, 0], sizes = [1, 32], strides = [1, 1]} : vector<6x32xf32> to vector<1x32xf32>
    %cst_25 = arith.constant dense<0.000000e+00> : vector<16xf32>
    %97 = vector.multi_reduction <add>, %94, %cst_25 [1] : vector<16x32xf32> to vector<16xf32>
    %98 = vector.shape_cast %97 : vector<16xf32> to vector<16x1xf32>
    %cst_26 = arith.constant 3.200000e+01 : f32
    %99 = vector.broadcast %cst_26 : f32 to vector<16x1xf32>
    %100 = arith.divf %98, %99 : vector<16x1xf32>
    %101 = vector.broadcast %100 : vector<16x1xf32> to vector<16x32xf32>
    %102 = arith.subf %94, %101 : vector<16x32xf32>
    %103 = arith.mulf %102, %102 : vector<16x32xf32>
    %cst_27 = arith.constant dense<0.000000e+00> : vector<16xf32>
    %104 = vector.multi_reduction <add>, %103, %cst_27 [1] : vector<16x32xf32> to vector<16xf32>
    %105 = vector.shape_cast %104 : vector<16xf32> to vector<16x1xf32>
    %cst_28 = arith.constant 3.200000e+01 : f32
    %106 = vector.broadcast %cst_28 : f32 to vector<16x1xf32>
    %107 = arith.divf %105, %106 : vector<16x1xf32>
    %cst_29 = arith.constant 9.99999974E-6 : f32
    %108 = vector.broadcast %cst_29 : f32 to vector<16x1xf32>
    %109 = arith.addf %107, %108 : vector<16x1xf32>
    %110 = math.rsqrt %109 : vector<16x1xf32>
    %111 = vector.broadcast %110 : vector<16x1xf32> to vector<16x32xf32>
    %112 = arith.mulf %102, %111 : vector<16x32xf32>
    %113 = vector.broadcast %95 : vector<1x32xf32> to vector<16x32xf32>
    %114 = arith.mulf %112, %113 : vector<16x32xf32>
    %115 = vector.broadcast %96 : vector<1x32xf32> to vector<16x32xf32>
    %116 = arith.addf %114, %115 : vector<16x32xf32>
    %117 = tpu.concatenate %116, %2 in 0 : vector<16x32xf32>, vector<16x32xf32> -> vector<32x32xf32>
    %cst_30 = arith.constant dense<0.000000e+00> : vector<32x96xf32>
    %118 = tpu.matmul %117, %9, %cst_30 {dimension_numbers = #tpu.dot_dimension_numbers<[1], [0], [0], [1], [0, 0, 1, 1], [], []>} : vector<32x32xf32>, vector<32x96xf32>, vector<32x96xf32> -> vector<32x96xf32>
    %119 = vector.broadcast %10 : vector<1x96xf32> to vector<32x96xf32>
    %120 = arith.addf %118, %119 : vector<32x96xf32>
    %121 = vector.extract_strided_slice %120 {offsets = [0, 0], sizes = [16, 32], strides = [1, 1]} : vector<32x96xf32> to vector<16x32xf32>
    %122 = vector.extract_strided_slice %120 {offsets = [16, 32], sizes = [16, 32], strides = [1, 1]} : vector<32x96xf32> to vector<16x32xf32>
    %123 = vector.extract_strided_slice %120 {offsets = [16, 64], sizes = [16, 32], strides = [1, 1]} : vector<32x96xf32> to vector<16x32xf32>
    %124 = vector.extract_strided_slice %121 {offsets = [0, 0], sizes = [16, 8], strides = [1, 1]} : vector<16x32xf32> to vector<16x8xf32>
    %125 = vector.extract_strided_slice %122 {offsets = [0, 0], sizes = [16, 8], strides = [1, 1]} : vector<16x32xf32> to vector<16x8xf32>
    %cst_31 = arith.constant dense<0.000000e+00> : vector<16x16xf32>
    %126 = tpu.matmul %124, %125, %cst_31 {dimension_numbers = #tpu.dot_dimension_numbers<[1], [1], [0], [0], [0, 0, 1, 0], [], []>} : vector<16x8xf32>, vector<16x8xf32>, vector<16x16xf32> -> vector<16x16xf32>
    %127 = arith.addf %126, %4 : vector<16x16xf32>
    %cst_32 = arith.constant dense<0xFF800000> : vector<16xf32>
    %128 = vector.multi_reduction <maximumf>, %127, %cst_32 [1] : vector<16x16xf32> to vector<16xf32>
    %129 = vector.shape_cast %128 : vector<16xf32> to vector<16x1xf32>
    %130 = vector.broadcast %129 : vector<16x1xf32> to vector<16x16xf32>
    %131 = arith.subf %127, %130 : vector<16x16xf32>
    %132 = math.exp %131 : vector<16x16xf32>
    %cst_33 = arith.constant dense<0.000000e+00> : vector<16xf32>
    %133 = vector.multi_reduction <add>, %132, %cst_33 [1] : vector<16x16xf32> to vector<16xf32>
    %134 = vector.shape_cast %133 : vector<16xf32> to vector<16x1xf32>
    %135 = tpu.reciprocal %134 : vector<16x1xf32> -> vector<16x1xf32>
    %136 = vector.broadcast %135 : vector<16x1xf32> to vector<16x16xf32>
    %137 = arith.mulf %132, %136 : vector<16x16xf32>
    %138 = vector.extract_strided_slice %123 {offsets = [0, 0], sizes = [16, 8], strides = [1, 1]} : vector<16x32xf32> to vector<16x8xf32>
    %cst_34 = arith.constant dense<0.000000e+00> : vector<16x8xf32>
    %139 = tpu.matmul %137, %138, %cst_34 {dimension_numbers = #tpu.dot_dimension_numbers<[1], [0], [0], [1], [0, 0, 1, 1], [], []>} : vector<16x16xf32>, vector<16x8xf32>, vector<16x8xf32> -> vector<16x8xf32>
    %140 = vector.extract_strided_slice %121 {offsets = [0, 8], sizes = [16, 8], strides = [1, 1]} : vector<16x32xf32> to vector<16x8xf32>
    %141 = vector.extract_strided_slice %122 {offsets = [0, 8], sizes = [16, 8], strides = [1, 1]} : vector<16x32xf32> to vector<16x8xf32>
    %cst_35 = arith.constant dense<0.000000e+00> : vector<16x16xf32>
    %142 = tpu.matmul %140, %141, %cst_35 {dimension_numbers = #tpu.dot_dimension_numbers<[1], [1], [0], [0], [0, 0, 1, 0], [], []>} : vector<16x8xf32>, vector<16x8xf32>, vector<16x16xf32> -> vector<16x16xf32>
    %143 = arith.addf %142, %4 : vector<16x16xf32>
    %cst_36 = arith.constant dense<0xFF800000> : vector<16xf32>
    %144 = vector.multi_reduction <maximumf>, %143, %cst_36 [1] : vector<16x16xf32> to vector<16xf32>
    %145 = vector.shape_cast %144 : vector<16xf32> to vector<16x1xf32>
    %146 = vector.broadcast %145 : vector<16x1xf32> to vector<16x16xf32>
    %147 = arith.subf %143, %146 : vector<16x16xf32>
    %148 = math.exp %147 : vector<16x16xf32>
    %cst_37 = arith.constant dense<0.000000e+00> : vector<16xf32>
    %149 = vector.multi_reduction <add>, %148, %cst_37 [1] : vector<16x16xf32> to vector<16xf32>
    %150 = vector.shape_cast %149 : vector<16xf32> to vector<16x1xf32>
    %151 = tpu.reciprocal %150 : vector<16x1xf32> -> vector<16x1xf32>
    %152 = vector.broadcast %151 : vector<16x1xf32> to vector<16x16xf32>
    %153 = arith.mulf %148, %152 : vector<16x16xf32>
    %154 = vector.extract_strided_slice %123 {offsets = [0, 8], sizes = [16, 8], strides = [1, 1]} : vector<16x32xf32> to vector<16x8xf32>
    %cst_38 = arith.constant dense<0.000000e+00> : vector<16x8xf32>
    %155 = tpu.matmul %153, %154, %cst_38 {dimension_numbers = #tpu.dot_dimension_numbers<[1], [0], [0], [1], [0, 0, 1, 1], [], []>} : vector<16x16xf32>, vector<16x8xf32>, vector<16x8xf32> -> vector<16x8xf32>
    %156 = vector.extract_strided_slice %121 {offsets = [0, 16], sizes = [16, 8], strides = [1, 1]} : vector<16x32xf32> to vector<16x8xf32>
    %157 = vector.extract_strided_slice %122 {offsets = [0, 16], sizes = [16, 8], strides = [1, 1]} : vector<16x32xf32> to vector<16x8xf32>
    %cst_39 = arith.constant dense<0.000000e+00> : vector<16x16xf32>
    %158 = tpu.matmul %156, %157, %cst_39 {dimension_numbers = #tpu.dot_dimension_numbers<[1], [1], [0], [0], [0, 0, 1, 0], [], []>} : vector<16x8xf32>, vector<16x8xf32>, vector<16x16xf32> -> vector<16x16xf32>
    %159 = arith.addf %158, %4 : vector<16x16xf32>
    %cst_40 = arith.constant dense<0xFF800000> : vector<16xf32>
    %160 = vector.multi_reduction <maximumf>, %159, %cst_40 [1] : vector<16x16xf32> to vector<16xf32>
    %161 = vector.shape_cast %160 : vector<16xf32> to vector<16x1xf32>
    %162 = vector.broadcast %161 : vector<16x1xf32> to vector<16x16xf32>
    %163 = arith.subf %159, %162 : vector<16x16xf32>
    %164 = math.exp %163 : vector<16x16xf32>
    %cst_41 = arith.constant dense<0.000000e+00> : vector<16xf32>
    %165 = vector.multi_reduction <add>, %164, %cst_41 [1] : vector<16x16xf32> to vector<16xf32>
    %166 = vector.shape_cast %165 : vector<16xf32> to vector<16x1xf32>
    %167 = tpu.reciprocal %166 : vector<16x1xf32> -> vector<16x1xf32>
    %168 = vector.broadcast %167 : vector<16x1xf32> to vector<16x16xf32>
    %169 = arith.mulf %164, %168 : vector<16x16xf32>
    %170 = vector.extract_strided_slice %123 {offsets = [0, 16], sizes = [16, 8], strides = [1, 1]} : vector<16x32xf32> to vector<16x8xf32>
    %cst_42 = arith.constant dense<0.000000e+00> : vector<16x8xf32>
    %171 = tpu.matmul %169, %170, %cst_42 {dimension_numbers = #tpu.dot_dimension_numbers<[1], [0], [0], [1], [0, 0, 1, 1], [], []>} : vector<16x16xf32>, vector<16x8xf32>, vector<16x8xf32> -> vector<16x8xf32>
    %172 = vector.extract_strided_slice %121 {offsets = [0, 24], sizes = [16, 8], strides = [1, 1]} : vector<16x32xf32> to vector<16x8xf32>
    %173 = vector.extract_strided_slice %122 {offsets = [0, 24], sizes = [16, 8], strides = [1, 1]} : vector<16x32xf32> to vector<16x8xf32>
    %cst_43 = arith.constant dense<0.000000e+00> : vector<16x16xf32>
    %174 = tpu.matmul %172, %173, %cst_43 {dimension_numbers = #tpu.dot_dimension_numbers<[1], [1], [0], [0], [0, 0, 1, 0], [], []>} : vector<16x8xf32>, vector<16x8xf32>, vector<16x16xf32> -> vector<16x16xf32>
    %175 = arith.addf %174, %4 : vector<16x16xf32>
    %cst_44 = arith.constant dense<0xFF800000> : vector<16xf32>
    %176 = vector.multi_reduction <maximumf>, %175, %cst_44 [1] : vector<16x16xf32> to vector<16xf32>
    %177 = vector.shape_cast %176 : vector<16xf32> to vector<16x1xf32>
    %178 = vector.broadcast %177 : vector<16x1xf32> to vector<16x16xf32>
    %179 = arith.subf %175, %178 : vector<16x16xf32>
    %180 = math.exp %179 : vector<16x16xf32>
    %cst_45 = arith.constant dense<0.000000e+00> : vector<16xf32>
    %181 = vector.multi_reduction <add>, %180, %cst_45 [1] : vector<16x16xf32> to vector<16xf32>
    %182 = vector.shape_cast %181 : vector<16xf32> to vector<16x1xf32>
    %183 = tpu.reciprocal %182 : vector<16x1xf32> -> vector<16x1xf32>
    %184 = vector.broadcast %183 : vector<16x1xf32> to vector<16x16xf32>
    %185 = arith.mulf %180, %184 : vector<16x16xf32>
    %186 = vector.extract_strided_slice %123 {offsets = [0, 24], sizes = [16, 8], strides = [1, 1]} : vector<16x32xf32> to vector<16x8xf32>
    %cst_46 = arith.constant dense<0.000000e+00> : vector<16x8xf32>
    %187 = tpu.matmul %185, %186, %cst_46 {dimension_numbers = #tpu.dot_dimension_numbers<[1], [0], [0], [1], [0, 0, 1, 1], [], []>} : vector<16x16xf32>, vector<16x8xf32>, vector<16x8xf32> -> vector<16x8xf32>
    %188 = tpu.concatenate %139, %155, %171, %187 in 1 : vector<16x8xf32>, vector<16x8xf32>, vector<16x8xf32>, vector<16x8xf32> -> vector<16x32xf32>
    %cst_47 = arith.constant dense<0.000000e+00> : vector<16x32xf32>
    %189 = tpu.matmul %188, %13, %cst_47 {dimension_numbers = #tpu.dot_dimension_numbers<[1], [0], [0], [1], [0, 0, 1, 1], [], []>} : vector<16x32xf32>, vector<32x32xf32>, vector<16x32xf32> -> vector<16x32xf32>
    %190 = vector.broadcast %14 : vector<1x32xf32> to vector<16x32xf32>
    %191 = arith.addf %189, %190 : vector<16x32xf32>
    %192 = arith.addf %116, %191 : vector<16x32xf32>
    %193 = vector.extract_strided_slice %19 {offsets = [1, 0], sizes = [1, 32], strides = [1, 1]} : vector<6x32xf32> to vector<1x32xf32>
    %194 = vector.extract_strided_slice %19 {offsets = [4, 0], sizes = [1, 32], strides = [1, 1]} : vector<6x32xf32> to vector<1x32xf32>
    %cst_48 = arith.constant dense<0.000000e+00> : vector<16xf32>
    %195 = vector.multi_reduction <add>, %192, %cst_48 [1] : vector<16x32xf32> to vector<16xf32>
    %196 = vector.shape_cast %195 : vector<16xf32> to vector<16x1xf32>
    %cst_49 = arith.constant 3.200000e+01 : f32
    %197 = vector.broadcast %cst_49 : f32 to vector<16x1xf32>
    %198 = arith.divf %196, %197 : vector<16x1xf32>
    %199 = vector.broadcast %198 : vector<16x1xf32> to vector<16x32xf32>
    %200 = arith.subf %192, %199 : vector<16x32xf32>
    %201 = arith.mulf %200, %200 : vector<16x32xf32>
    %cst_50 = arith.constant dense<0.000000e+00> : vector<16xf32>
    %202 = vector.multi_reduction <add>, %201, %cst_50 [1] : vector<16x32xf32> to vector<16xf32>
    %203 = vector.shape_cast %202 : vector<16xf32> to vector<16x1xf32>
    %cst_51 = arith.constant 3.200000e+01 : f32
    %204 = vector.broadcast %cst_51 : f32 to vector<16x1xf32>
    %205 = arith.divf %203, %204 : vector<16x1xf32>
    %cst_52 = arith.constant 9.99999974E-6 : f32
    %206 = vector.broadcast %cst_52 : f32 to vector<16x1xf32>
    %207 = arith.addf %205, %206 : vector<16x1xf32>
    %208 = math.rsqrt %207 : vector<16x1xf32>
    %209 = vector.broadcast %208 : vector<16x1xf32> to vector<16x32xf32>
    %210 = arith.mulf %200, %209 : vector<16x32xf32>
    %211 = vector.broadcast %193 : vector<1x32xf32> to vector<16x32xf32>
    %212 = arith.mulf %210, %211 : vector<16x32xf32>
    %213 = vector.broadcast %194 : vector<1x32xf32> to vector<16x32xf32>
    %214 = arith.addf %212, %213 : vector<16x32xf32>
    %cst_53 = arith.constant dense<0.000000e+00> : vector<16x64xf32>
    %215 = tpu.matmul %214, %15, %cst_53 {dimension_numbers = #tpu.dot_dimension_numbers<[1], [0], [0], [1], [0, 0, 1, 1], [], []>} : vector<16x32xf32>, vector<32x64xf32>, vector<16x64xf32> -> vector<16x64xf32>
    %216 = vector.broadcast %16 : vector<1x64xf32> to vector<16x64xf32>
    %217 = arith.addf %215, %216 : vector<16x64xf32>
    %cst_54 = arith.constant 0.000000e+00 : f32
    %218 = vector.broadcast %cst_54 : f32 to vector<16x64xf32>
    %219 = arith.maximumf %217, %218 : vector<16x64xf32>
    %cst_55 = arith.constant dense<0.000000e+00> : vector<16x32xf32>
    %220 = tpu.matmul %219, %17, %cst_55 {dimension_numbers = #tpu.dot_dimension_numbers<[1], [0], [0], [1], [0, 0, 1, 1], [], []>} : vector<16x64xf32>, vector<64x32xf32>, vector<16x32xf32> -> vector<16x32xf32>
    %221 = vector.broadcast %18 : vector<1x32xf32> to vector<16x32xf32>
    %222 = arith.addf %220, %221 : vector<16x32xf32>
    %223 = arith.addf %214, %222 : vector<16x32xf32>
    %224 = vector.extract_strided_slice %19 {offsets = [2, 0], sizes = [1, 32], strides = [1, 1]} : vector<6x32xf32> to vector<1x32xf32>
    %225 = vector.extract_strided_slice %19 {offsets = [5, 0], sizes = [1, 32], strides = [1, 1]} : vector<6x32xf32> to vector<1x32xf32>
    %cst_56 = arith.constant dense<0.000000e+00> : vector<16xf32>
    %226 = vector.multi_reduction <add>, %223, %cst_56 [1] : vector<16x32xf32> to vector<16xf32>
    %227 = vector.shape_cast %226 : vector<16xf32> to vector<16x1xf32>
    %cst_57 = arith.constant 3.200000e+01 : f32
    %228 = vector.broadcast %cst_57 : f32 to vector<16x1xf32>
    %229 = arith.divf %227, %228 : vector<16x1xf32>
    %230 = vector.broadcast %229 : vector<16x1xf32> to vector<16x32xf32>
    %231 = arith.subf %223, %230 : vector<16x32xf32>
    %232 = arith.mulf %231, %231 : vector<16x32xf32>
    %cst_58 = arith.constant dense<0.000000e+00> : vector<16xf32>
    %233 = vector.multi_reduction <add>, %232, %cst_58 [1] : vector<16x32xf32> to vector<16xf32>
    %234 = vector.shape_cast %233 : vector<16xf32> to vector<16x1xf32>
    %cst_59 = arith.constant 3.200000e+01 : f32
    %235 = vector.broadcast %cst_59 : f32 to vector<16x1xf32>
    %236 = arith.divf %234, %235 : vector<16x1xf32>
    %cst_60 = arith.constant 9.99999974E-6 : f32
    %237 = vector.broadcast %cst_60 : f32 to vector<16x1xf32>
    %238 = arith.addf %236, %237 : vector<16x1xf32>
    %239 = math.rsqrt %238 : vector<16x1xf32>
    %240 = vector.broadcast %239 : vector<16x1xf32> to vector<16x32xf32>
    %241 = arith.mulf %231, %240 : vector<16x32xf32>
    %242 = vector.broadcast %224 : vector<1x32xf32> to vector<16x32xf32>
    %243 = arith.mulf %241, %242 : vector<16x32xf32>
    %244 = vector.broadcast %225 : vector<1x32xf32> to vector<16x32xf32>
    %245 = arith.addf %243, %244 : vector<16x32xf32>
    %c0_61 = arith.constant 0 : index
    %c0_62 = arith.constant 0 : index
    %246 = vector.load %arg4[%c0_61, %c0_62] : memref<16x32xf32, #tpu.memory_space<vmem>>, vector<16x32xf32>
    tpu.vector_store %arg4[%c0_61, %c0_62], %245 {strides = array<i32>} : memref<16x32xf32, #tpu.memory_space<vmem>>, vector<16x32xf32>,
    return
  }
}

</mosaic_0001>

<bundles_post_ra>
// kernel: tpu_custom_call.1
= control target key start
LH: loop header
LB: loop body
LE: loop exit
PB: predicated region body
PF: predicated region fallthrough
CT: control target
= control target key end

     0   :  { %9 = vsyncpa [#allocation3], 0  ;;  %s2278_s0 = inlined_call_operand.vmem [shape: f32[32,32], index: 0, kind: input, shape index: {}]   ;;  %s2279_s1 = inlined_call_operand.vmem [shape: f32[32,16], index: 1, kind: input, shape index: {}]   ;;  %s2280_s2 = inlined_call_operand.hbm [shape: f32[80,96], index: 2, kind: input, shape index: {}]   ;;  %s2281_s3 = inlined_call_operand.hbm [shape: f32[160,96], index: 3, kind: input, shape index: {}]   ;;  %s2282_s4 = inlined_call_operand.hbm [shape: f32[16,32], index: 4, kind: output, shape index: {}]  }
   0x1   :  { %10 = vsyncpa [#allocation6], 0 }
   0x2   :  { %11 = vsyncpa [#allocation4], 0  ;;  %s20_s17 = sshll.u32 %s2280_s2, 4  ;;  %s1817_s18 = smov [#allocation2]   ;;  %s21_s17 = int_to_ptr.hbm [resolvable:$true] %s20_s17 }
   0x3   :  { %s22_s19 = sshll.u32 %s1817_s18, 4  ;;  %s33_s22 = sshll.u32 %s2281_s3, 4  ;;  %s23_s19 = int_to_ptr.vmem [resolvable:$true] %s22_s19  ;;  %s34_s22 = int_to_ptr.hbm [resolvable:$true] %s33_s22 }
   0x4   :  { %s1818_s23 = smov 128   ;;  %s1819_s24 = smov 8  }
   0x5   :  { %28 = dma.hbm_to_vmem [thread:$0]  %s21_s17, 1280, %s23_s19, [#allocation3], %s1818_s23, %s1818_s23, %s1819_s24  }
   0x6   :  { %s1820_s25 = smov [#allocation5]  }
   0x7   :  { %s35_s26 = sshll.u32 %s1820_s25, 4  ;;  %s36_s26 = int_to_ptr.vmem [resolvable:$true] %s35_s26 }
   0x8   :  { %41 = dma.hbm_to_vmem [thread:$0]  %s34_s22, 2560, %s36_s26, [#allocation6], %s1818_s23, %s1818_s23, %s1819_s24  }
   0x9   :  { %1811 = dma.done.wait [#allocation3], 1280  }
   0xa   :  { %1812 = vsyncadd [#allocation3], 4294966016 }
   0xb   :  { %1813 = dma.done.wait [#allocation6], 2560  }
   0xc   :  { %1814 = vsyncadd [#allocation6], 4294964736  ;;  %v61_v0 = vld [vmem:[#allocation2 + $0x18] sm:$0xff]  ;;  %v60_v1 = vld [vmem:[#allocation2 + $0x10] sm:$0xff]  ;;  %vm89_vm0 = vcmask 261120   ;;  %s1821_s29 = smov 120  }
   0xd   :  { %108 = vmatpush.msra.mxu0 %v61_v0  ;;  %1587 = vmatpush.msra.mxu3 %v61_v0  ;;  %v59_v2 = vld [vmem:[#allocation2 + $0x8] sm:$0xff]  ;;  %v58_v3 = vld [vmem:[#allocation2] sm:$0xff]  ;;  %s1822_s30 = smov 88   ;;  %s1823_s5 = smov 96   ;;  %vm125_vm1 = vcmask 64512   ;;  %vm157_vm2 = vcmask 130048  }
   0xe   :  { %v1876_v4 = vld [vmem:[%s2278_s0] sm:$0xff]  ;;  %v1881_v5 = vld [vmem:[%s2278_s0 + $0x8] sm:$0xff]  ;;  %s1824_s6 = smov 104   ;;  %s1825_s7 = smov 72  }
   0xf   :  { %109 = vmatpush.msra.mxu0 %v60_v1  ;;  %1588 = vmatpush.msra.mxu3 %v60_v1  ;;  %v62_v6 = vld [vmem:[#allocation2 + $0x20] sm:$0xff]  ;;  %s1826_s8 = smov 80   ;;  %s1827_s9 = smov 112   ;;  %v55_v31 = vld [vmem:[%s2279_s1 + $0x8] sm:$0xff] }
  0x10   :  { %v88_v7 = vperm.slane %v62_v6, 0  ;;  %v54_v26 = vld [vmem:[%s2279_s1] sm:$0xff]  ;;  %s1828_s14 = smov 56   ;;  %s1829_s15 = smov 64  }
  0x11   :  { %110 = vmatpush.msra.mxu0 %v59_v2  ;;  %1589 = vmatpush.msra.mxu3 %v59_v2  ;;  %s1830_s16 = smov 48   ;;  %s1831_s17 = smov 40  }
  0x12   :  { %s1832_s18 = smov 16   ;;  %s1833_s19 = smov 24  }
  0x13   :  { %111 = vmatpush.msra.mxu0 %v58_v3  ;;  %1590 = vmatpush.msra.mxu3 %v58_v3 }
  0x14   :  { %1525 = vmatmul.msk.f32.vlgmr.msra.gmra.mxu0 %vm89_vm0, %v1876_v4  ;;  %1526 = vmatmul.msk.f32.vlgmr.msra.gmra.mxu3 %vm89_vm0, %v1881_v5 }
  0x91   :  { %v113_v8 = vpop.f32.mrf.mxu0 }
  0x92   :  { %v1887_v9 = vadd.f32 %v113_v8, %v88_v7 }
  0x94   :  { %241 = vrot.lane.b32.xlu2 %v1887_v9, %s1821_s29 }
  0x97   :  { %v116_v10 = vpop.f32.mrf.mxu3 }
  0x98   :  { %v1891_v11 = vadd.f32 %v116_v10, %v88_v7 }
  0x9a   :  { %247 = vrot.lane.b32.xlu1 %v1891_v11, %s1822_s30  ;;  %123 = vrot.lane.b32.xlu0 %v1891_v11, %s1823_s5  ;;  %v1956_v52 = vpack.i.bf16 %v1887_v9, %v1891_v11 }
  0x9c   :  { %243 = vrot.lane.b32.xlu2 %v1891_v11, %s1821_s29 }
  0xa2   :  { %245 = vrot.lane.b32.xlu1 %v1887_v9, %s1822_s30  ;;  %121 = vrot.lane.b32.xlu0 %v1887_v9, %s1823_s5 }
  0xa4   :  { %485 = vrot.lane.b32.xlu2 %v1887_v9, %s1824_s6 }
  0xaa   :  { %489 = vrot.lane.b32.xlu1 %v1887_v9, %s1825_s7  ;;  %491 = vrot.lane.b32.xlu0 %v1891_v11, %s1825_s7 }
  0xac   :  { %487 = vrot.lane.b32.xlu2 %v1891_v11, %s1824_s6 }
  0xb2   :  { %367 = vrot.lane.b32.xlu1 %v1887_v9, %s1826_s8  ;;  %369 = vrot.lane.b32.xlu0 %v1891_v11, %s1826_s8 }
  0xba   :  { %365 = vrot.lane.b32.xlu1 %v1891_v11, %s1827_s9  ;;  %363 = vrot.lane.b32.xlu0 %v1887_v9, %s1827_s9 }
  0xee   :  { %v242_v14 = vpop.permute.xlu2 %241 }
  0xf6   :  { %v244_v17 = vpop.permute.xlu2 %243 }
  0xfe   :  { %v486_v21 = vpop.permute.xlu2 %485 }
 0x106   :  { %v488_v24 = vpop.permute.xlu2 %487 }
 0x10c   :  { %v248_v12 = vpop.permute.xlu1 %247  ;;  %v124_v13 = vpop.permute.xlu0 %123 }
 0x10d   :  { %1527 = vmatpush.xpose.msk.msra.mxu1 %vm125_vm1, %v124_v13  ;;  %1533 = vmatpush.xpose.msk.msrb.mxu3 %vm125_vm1, %v248_v12 }
 0x114   :  { %v246_v15 = vpop.permute.xlu1 %245  ;;  %v122_v16 = vpop.permute.xlu0 %121 }
 0x115   :  { %1528 = vmatpush.xpose.msk.msra.mxu1 %vm125_vm1, %v122_v16  ;;  %1534 = vmatpush.xpose.msk.msrb.mxu3 %vm125_vm1, %v246_v15 }
 0x118   :  { %1529 = vmatmul.msk.f32.vlgmr.msra.gmra.mxu1 %vm125_vm1, %v1887_v9  ;;  %1535 = vmatmul.msk.f32.vlgmr.msrb.gmra.mxu3 %vm125_vm1, %v242_v14 }
 0x11c   :  { %v492_v18 = vpop.permute.xlu0 %491  ;;  %v490_v19 = vpop.permute.xlu1 %489 }
 0x11d   :  { %1545 = vmatpush.xpose.msk.msra.mxu3 %vm125_vm1, %v492_v18 }
 0x120   :  { %1530 = vmatmul.msk.f32.gmra.mxu1 %vm125_vm1, %v1891_v11  ;;  %1536 = vmatmul.msk.f32.gmra.mxu3 %vm125_vm1, %v244_v17 }
 0x121   :  { %1546 = vmatpush.xpose.msk.msra.mxu3 %vm125_vm1, %v490_v19 }
 0x124   :  { %v370_v20 = vpop.permute.xlu0 %369  ;;  %v368_v22 = vpop.permute.xlu1 %367 }
 0x125   :  { %1539 = vmatpush.xpose.msk.msrb.mxu0 %vm125_vm1, %v370_v20 }
 0x128   :  { %1547 = vmatmul.msk.f32.vlgmr.msra.gmra.mxu3 %vm125_vm1, %v486_v21 }
 0x129   :  { %1540 = vmatpush.xpose.msk.msrb.mxu0 %vm125_vm1, %v368_v22 }
 0x12c   :  { %v364_v23 = vpop.permute.xlu0 %363  ;;  %v366_v25 = vpop.permute.xlu1 %365 }
 0x12d   :  { %1541 = vmatmul.msk.f32.vlgmr.msrb.gmra.mxu0 %vm125_vm1, %v364_v23 }
 0x130   :  { %1548 = vmatmul.msk.f32.gmra.mxu3 %vm125_vm1, %v488_v24 }
 0x135   :  { %1542 = vmatmul.msk.f32.gmra.mxu0 %vm125_vm1, %v366_v25 }
 0x195   :  { %v151_v27 = vpop.f32.mrf.mxu1 }
 0x196   :  { %v152_v28 = vadd.f32 %v151_v27, %v54_v26 }
 0x198   :  { %v158_v29 = vsel %vm157_vm2, %v152_v28, -inf }
 0x199   :  { %159 = vmax.xlane.f32.xlu2 %v158_v29 }
 0x19b   :  { %v274_v30 = vpop.f32.mrf.mxu3 }
 0x19c   :  { %v275_v32 = vadd.f32 %v274_v30, %v54_v26 }
 0x19d   :  { %v154_v33 = vpop.f32.mrf.mxu1 }
 0x19e   :  { %v155_v34 = vadd.f32 %v154_v33, %v55_v31  ;;  %v280_v35 = vsel %vm157_vm2, %v275_v32, -inf }
 0x19f   :  { %281 = vmax.xlane.f32.xlu1 %v280_v35 }
 0x1a0   :  { %v161_v36 = vsel %vm157_vm2, %v155_v34, -inf }
 0x1a1   :  { %162 = vmax.xlane.f32.xlu0 %v161_v36 }
 0x1a3   :  { %v277_v37 = vpop.f32.mrf.mxu3 }
 0x1a4   :  { %v278_v48 = vadd.f32 %v277_v37, %v55_v31 }
 0x1a6   :  { %v283_v49 = vsel %vm157_vm2, %v278_v48, -inf }
 0x1aa   :  { %v396_v38 = vpop.f32.mrf.mxu0 }
 0x1ab   :  { %v397_v39 = vadd.f32 %v396_v38, %v54_v26  ;;  %v518_v40 = vpop.f32.mrf.mxu3 }
 0x1ac   :  { %v519_v50 = vadd.f32 %v518_v40, %v54_v26 }
 0x1ad   :  { %v402_v41 = vsel %vm157_vm2, %v397_v39, -inf }
 0x1ae   :  { %403 = vmax.xlane.f32.xlu0 %v402_v41  ;;  %v524_v51 = vsel %vm157_vm2, %v519_v50, -inf }
 0x1b2   :  { %v399_v42 = vpop.f32.mrf.mxu0 }
 0x1b3   :  { %v400_v43 = vadd.f32 %v399_v42, %v55_v31  ;;  %v521_v44 = vpop.f32.mrf.mxu3 }
 0x1b4   :  { %v1947_v45 = vadd.f32 %v521_v44, %v55_v31 }
 0x1b5   :  { %v405_v46 = vsel %vm157_vm2, %v400_v43, -inf }
 0x1b6   :  { %406 = vmax.xlane.f32.xlu2 %v405_v46  ;;  %v527_v47 = vsel %vm157_vm2, %v1947_v45, -inf }
 0x1b7   :  { %528 = vmax.xlane.f32.xlu1 %v527_v47 }
 0x1be   :  { %284 = vmax.xlane.f32.xlu2 %v283_v49 }
 0x1c6   :  { %525 = vmax.xlane.f32.xlu2 %v524_v51 }
 0x1d0   :  { %1616 = vrot.lane.b32.xlu1 %v1956_v52, %s1828_s14 }
 0x20c   :  { %v160_v53 = vpop.xlane.xlu2 %159 }
 0x20d   :  { %v164_v54 = vsub.f32 %v152_v28, %v160_v53 }
 0x20f   :  { %v166_v55 = vmul.f32 1.442695, %v164_v54 }
 0x211   :  { %1660 = vpow2.f32 %v166_v55 }
 0x212   :  { %v282_v63 = vpop.xlane.xlu1 %281 }
 0x213   :  { %v286_v2 = vsub.f32 %v275_v32, %v282_v63 }
 0x214   :  { %v163_v56 = vpop.xlane.xlu0 %162 }
 0x215   :  { %v165_v57 = vsub.f32 %v155_v34, %v163_v56  ;;  %v288_v6 = vmul.f32 1.442695, %v286_v2 }
 0x217   :  { %v1960_v58 = vpop.eup %1660  ;;  %v168_v59 = vmul.f32 1.442695, %v165_v57 }
 0x218   :  { %v170_v60 = vsel %vm157_vm2, %v1960_v58, 0.0 }
 0x219   :  { %1662 = vpow2.f32 %v168_v59  ;;  %171 = vadd.xlane.f32.xlu0 %v170_v60 }
 0x21f   :  { %v1964_v61 = vpop.eup %1662 }
 0x220   :  { %v173_v62 = vsel %vm157_vm2, %v1964_v61, 0.0 }
 0x221   :  { %174 = vadd.xlane.f32.xlu1 %v173_v62  ;;  %v404_v0 = vpop.xlane.xlu0 %403 }
 0x222   :  { %v408_v1 = vsub.f32 %v397_v39, %v404_v0 }
 0x224   :  { %v410_v3 = vmul.f32 1.442695, %v408_v1 }
 0x226   :  { %1664 = vpow2.f32 %v410_v3 }
 0x227   :  { %1666 = vpow2.f32 %v288_v6 }
 0x229   :  { %v407_v7 = vpop.xlane.xlu2 %406 }
 0x22a   :  { %v409_v18 = vsub.f32 %v400_v43, %v407_v7  ;;  %v529_v22 = vpop.xlane.xlu1 %528 }
 0x22b   :  { %v531_v24 = vsub.f32 %v1947_v45, %v529_v22 }
 0x22c   :  { %v1968_v8 = vpop.eup %1664  ;;  %v412_v21 = vmul.f32 1.442695, %v409_v18 }
 0x22d   :  { %1611 = vrot.lane.b32.xlu0 %v1956_v52, %s1829_s15  ;;  %v414_v9 = vsel %vm157_vm2, %v1968_v8, 0.0  ;;  %v1974_v11 = vpop.eup %1666  ;;  %v534_v26 = vmul.f32 1.442695, %v531_v24 }
 0x22e   :  { %415 = vadd.xlane.f32.xlu2 %v414_v9  ;;  %v292_v14 = vsel %vm157_vm2, %v1974_v11, 0.0 }
 0x231   :  { %v285_v10 = vpop.xlane.xlu2 %284 }
 0x232   :  { %v287_v12 = vsub.f32 %v278_v48, %v285_v10 }
 0x234   :  { %v290_v13 = vmul.f32 1.442695, %v287_v12 }
 0x236   :  { %1668 = vpow2.f32 %v290_v13  ;;  %293 = vadd.xlane.f32.xlu2 %v292_v14 }
 0x239   :  { %v526_v15 = vpop.xlane.xlu2 %525 }
 0x23a   :  { %v530_v16 = vsub.f32 %v519_v50, %v526_v15 }
 0x23c   :  { %v1978_v17 = vpop.eup %1668  ;;  %v532_v19 = vmul.f32 1.442695, %v530_v16 }
 0x23d   :  { %v295_v20 = vsel %vm157_vm2, %v1978_v17, 0.0 }
 0x23e   :  { %1670 = vpow2.f32 %v532_v19  ;;  %296 = vadd.xlane.f32.xlu1 %v295_v20 }
 0x23f   :  { %1672 = vpow2.f32 %v412_v21 }
 0x240   :  { %1674 = vpow2.f32 %v534_v26 }
 0x242   :  { %v1617_v31 = vpop.permute.xlu1 %1616 }
 0x243   :  { %v1618_v56 = vunpack.i.l.bf16 %v1617_v31  ;;  %v1619_v60 = vunpack.i.h.bf16 %v1617_v31 }
 0x244   :  { %v1982_v23 = vpop.eup %1670 }
 0x245   :  { %v536_v25 = vsel %vm157_vm2, %v1982_v23, 0.0  ;;  %v1987_v27 = vpop.eup %1672 }
 0x246   :  { %537 = vadd.xlane.f32.xlu2 %v536_v25  ;;  %v417_v28 = vsel %vm157_vm2, %v1987_v27, 0.0  ;;  %v1991_v29 = vpop.eup %1674 }
 0x247   :  { %v539_v30 = vsel %vm157_vm2, %v1991_v29, 0.0 }
 0x24e   :  { %418 = vadd.xlane.f32.xlu2 %v417_v28 }
 0x257   :  { %540 = vadd.xlane.f32.xlu0 %v539_v30  ;;  %1626 = vrot.lane.b32.xlu1 %v1956_v52, %s1830_s16 }
 0x266   :  { %1621 = vrot.lane.b32.xlu2 %v1956_v52, %s1831_s17 }
 0x28c   :  { %v172_v32 = vpop.xlane.xlu0 %171 }
 0x28d   :  { %1676 = vrcp.f32 %v172_v32  ;;  %v187_v38 = vand.u32 2147483648, %v172_v32  ;;  %vm181_vm4 = vweird.f32 %v172_v32  ;;  %v185_v41 = vand.u32 2147483647, %v172_v32 }
 0x28f   :  { %v188_v44 = vor.u32 1.1754944e-38, %v187_v38  ;;  %vm186_vm6 = vcmp.eq.f32.partialorder %v185_v41, 8.507059e+37 }
 0x293   :  { %v1677_v33 = vpop.eup %1676 }
 0x294   :  { %v177_v34 = vmul.f32 %v1677_v33, %v172_v32  ;;  %v175_v35 = vpop.xlane.xlu1 %174  ;;  %vm182_vm3 = vweird.f32 %v1677_v33 }
 0x295   :  { %1678 = vrcp.f32 %v175_v35  ;;  %vm183_vm5 = vmor %vm181_vm4, %vm182_vm3  ;;  %v201_v51 = vand.u32 2147483648, %v175_v35  ;;  %vm195_vm8 = vweird.f32 %v175_v35  ;;  %v199_v55 = vand.u32 2147483647, %v175_v35 }
 0x296   :  { %v178_v36 = vsub.f32 1.0, %v177_v34 }
 0x297   :  { %v202_v59 = vor.u32 1.1754944e-38, %v201_v51  ;;  %vm200_vm10 = vcmp.eq.f32.partialorder %v199_v55, 8.507059e+37 }
 0x298   :  { %v179_v37 = vmul.f32 %v1677_v33, %v178_v36 }
 0x29a   :  { %v180_v39 = vadd.f32 %v1677_v33, %v179_v37 }
 0x29b   :  { %v1679_v40 = vpop.eup %1678 }
 0x29c   :  { %v191_v42 = vmul.f32 %v1679_v40, %v175_v35  ;;  %v184_v43 = vsel %vm183_vm5, %v1677_v33, %v180_v39  ;;  %vm196_vm7 = vweird.f32 %v1679_v40 }
 0x29d   :  { %v189_v49 = vsel %vm186_vm6, %v188_v44, %v184_v43  ;;  %vm197_vm9 = vmor %vm195_vm8, %vm196_vm7 }
 0x29e   :  { %v192_v45 = vsub.f32 1.0, %v191_v42  ;;  %v204_v53 = vmul.f32 %v1960_v58, %v189_v49 }
 0x29f   :  { %v1612_v46 = vpop.permute.xlu0 %1611 }
 0x2a0   :  { %v193_v47 = vmul.f32 %v1679_v40, %v192_v45  ;;  %v1613_v48 = vunpack.i.l.bf16 %v1612_v46  ;;  %v1614_v52 = vunpack.i.h.bf16 %v1612_v46 }
 0x2a1   :  { %v1999_v50 = vpop.xlane.xlu2 %415 }
 0x2a2   :  { %232 = vmatpush.msra.mxu2 %v1613_v48  ;;  %v194_v54 = vadd.f32 %v1679_v40, %v193_v47  ;;  %v431_v37 = vand.u32 2147483648, %v1999_v50  ;;  %vm425_vm7 = vweird.f32 %v1999_v50 }
 0x2a4   :  { %233 = vmatpush.msra.mxu2 %v1614_v52  ;;  %v198_v57 = vsel %vm197_vm9, %v1679_v40, %v194_v54  ;;  %v429_v40 = vand.u32 2147483647, %v1999_v50  ;;  %v432_v46 = vor.u32 1.1754944e-38, %v431_v37 }
 0x2a5   :  { %1531 = vmatmul.msk.f32.vlgmr.msra.gmra.mxu2 %vm157_vm2, %v204_v53  ;;  %v203_v62 = vsel %vm200_vm10, %v202_v59, %v198_v57 }
 0x2a6   :  { %354 = vmatpush.msrb.mxu2 %v1618_v56  ;;  %v205_v0 = vmul.f32 %v1964_v61, %v203_v62 }
 0x2a8   :  { %355 = vmatpush.msrb.mxu2 %v1619_v60 }
 0x2a9   :  { %v294_v63 = vpop.xlane.xlu2 %293 }
 0x2aa   :  { %1680 = vrcp.f32 %v294_v63  ;;  %v309_v9 = vand.u32 2147483648, %v294_v63  ;;  %v307_v12 = vand.u32 2147483647, %v294_v63  ;;  %vm303_vm12 = vweird.f32 %v294_v63 }
 0x2ab   :  { %1682 = vrcp.f32 %v1999_v50 }
 0x2ac   :  { %v310_v14 = vor.u32 1.1754944e-38, %v309_v9  ;;  %vm308_vm14 = vcmp.eq.f32.partialorder %v307_v12, 8.507059e+37 }
 0x2ad   :  { %1532 = vmatmul.msk.f32.gmra.mxu2 %vm157_vm2, %v205_v0 }
 0x2b0   :  { %v1681_v58 = vpop.eup %1680 }
 0x2b1   :  { %v299_v1 = vmul.f32 %v1681_v58, %v294_v63  ;;  %v297_v2 = vpop.xlane.xlu1 %296  ;;  %v2006_v3 = vpop.eup %1682  ;;  %vm304_vm11 = vweird.f32 %v1681_v58 }
 0x2b2   :  { %1684 = vrcp.f32 %v297_v2  ;;  %v421_v10 = vmul.f32 %v2006_v3, %v1999_v50  ;;  %vm305_vm13 = vmor %vm303_vm12, %vm304_vm11  ;;  %v323_v22 = vand.u32 2147483648, %v297_v2  ;;  %v321_v26 = vand.u32 2147483647, %v297_v2 }
 0x2b3   :  { %v300_v6 = vsub.f32 1.0, %v299_v1  ;;  %vm317_vm3 = vweird.f32 %v297_v2  ;;  %vm426_vm6 = vweird.f32 %v2006_v3  ;;  %vm430_vm11 = vcmp.eq.f32.partialorder %v429_v40, 8.507059e+37 }
 0x2b4   :  { %v422_v19 = vsub.f32 1.0, %v421_v10  ;;  %v324_v32 = vor.u32 1.1754944e-38, %v323_v22  ;;  %vm322_vm5 = vcmp.eq.f32.partialorder %v321_v26, 8.507059e+37  ;;  %vm2019_vm8 = vmor %vm425_vm7, %vm426_vm6 }
 0x2b5   :  { %v301_v7 = vmul.f32 %v1681_v58, %v300_v6 }
 0x2b6   :  { %v423_v28 = vmul.f32 %v2006_v3, %v422_v19 }
 0x2b7   :  { %v302_v13 = vadd.f32 %v1681_v58, %v301_v7 }
 0x2b8   :  { %v1685_v61 = vpop.eup %1684  ;;  %v424_v36 = vadd.f32 %v2006_v3, %v423_v28 }
 0x2b9   :  { %v313_v15 = vmul.f32 %v1685_v61, %v297_v2  ;;  %v538_v16 = vpop.xlane.xlu2 %537  ;;  %v306_v18 = vsel %vm305_vm13, %v1681_v58, %v302_v13  ;;  %vm318_vm15 = vweird.f32 %v1685_v61 }
 0x2ba   :  { %1686 = vrcp.f32 %v538_v16  ;;  %v311_v21 = vsel %vm308_vm14, %v310_v14, %v306_v18  ;;  %vm319_vm4 = vmor %vm317_vm3, %vm318_vm15  ;;  %v553_v41 = vand.u32 2147483648, %v538_v16  ;;  %v551_v44 = vand.u32 2147483647, %v538_v16 }
 0x2bb   :  { %v314_v20 = vsub.f32 1.0, %v313_v15  ;;  %v326_v24 = vmul.f32 %v1974_v11, %v311_v21  ;;  %v428_v45 = vsel %vm2019_vm8, %v2006_v3, %v424_v36  ;;  %vm547_vm10 = vweird.f32 %v538_v16 }
 0x2bc   :  { %v554_v48 = vor.u32 1.1754944e-38, %v553_v41  ;;  %vm552_vm13 = vcmp.eq.f32.partialorder %v551_v44, 8.507059e+37  ;;  %v433_v53 = vsel %vm430_vm11, %v432_v46, %v428_v45 }
 0x2bd   :  { %v315_v25 = vmul.f32 %v1685_v61, %v314_v20  ;;  %1537 = vmatmul.msk.f32.vlgmr.msrb.gmra.mxu2 %vm157_vm2, %v326_v24  ;;  %v448_v0 = vmul.f32 %v1968_v8, %v433_v53 }
 0x2bf   :  { %v316_v30 = vadd.f32 %v1685_v61, %v315_v25 }
 0x2c0   :  { %v1687_v31 = vpop.eup %1686 }
 0x2c1   :  { %v543_v33 = vmul.f32 %v1687_v31, %v538_v16  ;;  %v419_v34 = vpop.xlane.xlu2 %418  ;;  %v320_v35 = vsel %vm319_vm4, %v1685_v61, %v316_v30  ;;  %vm548_vm9 = vweird.f32 %v1687_v31  ;;  %v2041_v30 = vld [vmem:[#allocation5 + $0x18] sm:$0xff] }
 0x2c2   :  { %1688 = vrcp.f32 %v419_v34  ;;  %v325_v11 = vsel %vm322_vm5, %v324_v32, %v320_v35  ;;  %vm549_vm12 = vmor %vm547_vm10, %vm548_vm9  ;;  %v445_v60 = vand.u32 2147483648, %v419_v34  ;;  %v443_v2 = vand.u32 2147483647, %v419_v34  ;;  %657 = vmatpush.msra.mxu0 %v2041_v30 }
 0x2c3   :  { %v544_v38 = vsub.f32 1.0, %v543_v33  ;;  %v327_v39 = vmul.f32 %v1978_v17, %v325_v11  ;;  %vm439_vm15 = vweird.f32 %v419_v34  ;;  %v2049_v33 = vld [vmem:[#allocation5 + $0x8] sm:$0xff]  ;;  %vm635_vm9 = vcmask 195584  }
 0x2c4   :  { %v446_v6 = vor.u32 1.1754944e-38, %v445_v60  ;;  %vm444_vm4 = vcmp.eq.f32.partialorder %v443_v2, 8.507059e+37 }
 0x2c5   :  { %v545_v43 = vmul.f32 %v1687_v31, %v544_v38  ;;  %1538 = vmatmul.msk.f32.gmra.mxu2 %vm157_vm2, %v327_v39 }
 0x2c7   :  { %v546_v17 = vadd.f32 %v1687_v31, %v545_v43 }
 0x2c8   :  { %v1689_v47 = vpop.eup %1688 }
 0x2c9   :  { %v550_v49 = vsel %vm549_vm12, %v1687_v31, %v546_v17  ;;  %v435_v50 = vmul.f32 %v1689_v47, %v419_v34  ;;  %v1627_v51 = vpop.permute.xlu1 %1626  ;;  %v1622_v52 = vpop.permute.xlu2 %1621  ;;  %vm440_vm14 = vweird.f32 %v1689_v47  ;;  %v2043_v31 = vld [vmem:[#allocation5 + $0x10] sm:$0xff]  ;;  %v2051_v34 = vld [vmem:[#allocation5] sm:$0xff] }
 0x2ca   :  { %v555_v54 = vsel %vm552_vm13, %v554_v48, %v550_v49  ;;  %v1623_v55 = vunpack.i.l.bf16 %v1622_v52  ;;  %v541_v56 = vpop.xlane.xlu0 %540  ;;  %v1628_v57 = vunpack.i.l.bf16 %v1627_v51  ;;  %v1624_v62 = vunpack.i.h.bf16 %v1622_v52  ;;  %vm441_vm3 = vmor %vm439_vm15, %vm440_vm14  ;;  %658 = vmatpush.msra.mxu0 %v2043_v31  ;;  %v72_v17 = vld [vmem:[#allocation5 + $0x20] sm:$0xff] }
 0x2cb   :  { %v436_v59 = vsub.f32 1.0, %v435_v50  ;;  %1690 = vrcp.f32 %v541_v56  ;;  %v1629_v63 = vunpack.i.h.bf16 %v1627_v51  ;;  %v570_v1 = vmul.f32 %v1982_v23, %v555_v54 }
 0x2cc   :  { %476 = vmatpush.msrb.mxu1 %v1628_v57  ;;  %598 = vmatpush.msra.mxu2 %v1623_v55  ;;  %v567_v13 = vand.u32 2147483648, %v541_v56  ;;  %v565_v14 = vand.u32 2147483647, %v541_v56  ;;  %vm561_vm6 = vweird.f32 %v541_v56  ;;  %v1650_v32 = vpack.i.bf16 %v2043_v31, %v2041_v30 }
 0x2cd   :  { %v437_v58 = vmul.f32 %v1689_v47, %v436_v59  ;;  %659 = vmatpush.msra.mxu0 %v2049_v33  ;;  %v1655_v35 = vpack.i.bf16 %v2051_v34, %v2049_v33 }
 0x2ce   :  { %477 = vmatpush.msrb.mxu1 %v1629_v63  ;;  %599 = vmatpush.msra.mxu2 %v1624_v62  ;;  %v568_v16 = vor.u32 1.1754944e-38, %v567_v13  ;;  %vm566_vm8 = vcmp.eq.f32.partialorder %v565_v14, 8.507059e+37  ;;  %v64_v13 = vld [vmem:[#allocation2 + $0x30] sm:$0xff] }
 0x2cf   :  { %1543 = vmatmul.msk.f32.vlgmr.msrb.gmra.mxu1 %vm157_vm2, %v448_v0  ;;  %1549 = vmatmul.msk.f32.vlgmr.msra.gmra.mxu2 %vm157_vm2, %v570_v1  ;;  %v438_v3 = vadd.f32 %v1689_v47, %v437_v58 }
 0x2d0   :  { %660 = vmatpush.msra.mxu0 %v2051_v34 }
 0x2d1   :  { %v1691_v7 = vpop.eup %1690  ;;  %v442_v9 = vsel %vm441_vm3, %v1689_v47, %v438_v3  ;;  %v2065_v47 = vperm.slane %v72_v17, 0 }
 0x2d2   :  { %v557_v10 = vmul.f32 %v1691_v7, %v541_v56  ;;  %v447_v8 = vsel %vm444_vm4, %v446_v6, %v442_v9  ;;  %vm562_vm5 = vweird.f32 %v1691_v7  ;;  %v1834_v56 = vmov 32.0  }
 0x2d3   :  { %v449_v23 = vmul.f32 %v1987_v27, %v447_v8  ;;  %vm563_vm7 = vmor %vm561_vm6, %vm562_vm5  ;;  %1692 = vrcp.f32 %v1834_v56  ;;  %v66_v8 = vld [vmem:[#allocation2 + $0x40] sm:$0xff] }
 0x2d4   :  { %v558_v12 = vsub.f32 1.0, %v557_v10  ;;  %752 = vmatpush.msra.mxu1 %v66_v8 }
 0x2d6   :  { %v559_v61 = vmul.f32 %v1691_v7, %v558_v12  ;;  %v65_v12 = vld [vmem:[#allocation2 + $0x38] sm:$0xff] }
 0x2d7   :  { %1544 = vmatmul.msk.f32.gmra.mxu1 %vm157_vm2, %v449_v23  ;;  %v63_v23 = vld [vmem:[#allocation2 + $0x28] sm:$0xff] }
 0x2d8   :  { %v560_v15 = vadd.f32 %v1691_v7, %v559_v61  ;;  %753 = vmatpush.msra.mxu1 %v65_v12 }
 0x2d9   :  { %v1693_v57 = vpop.eup %1692 }
 0x2da   :  { %v564_v18 = vsel %vm563_vm7, %v1691_v7, %v560_v15  ;;  %v677_v59 = vmul.f32 32.0, %v1693_v57  ;;  %vm681_vm10 = vweird.f32 %v1693_v57  ;;  %754 = vmatpush.msra.mxu1 %v64_v13  ;;  %v2136_v13 = vld [vmem:[%s2279_s1 + $0x10] sm:$0xff] }
 0x2db   :  { %v569_v19 = vsel %vm566_vm8, %v568_v16, %v564_v18 }
 0x2dc   :  { %v571_v20 = vmul.f32 %v1991_v29, %v569_v19  ;;  %v678_v60 = vsub.f32 1.0, %v677_v59  ;;  %755 = vmatpush.msra.mxu1 %v63_v23 }
 0x2de   :  { %1550 = vmatmul.msk.f32.gmra.mxu2 %vm157_vm2, %v571_v20  ;;  %v679_v62 = vmul.f32 %v1693_v57, %v678_v60 }
 0x2e0   :  { %v680_v63 = vadd.f32 %v1693_v57, %v679_v62 }
 0x328   :  { %v235_v21 = vpop.f32.mrf.mxu2 }
 0x330   :  { %v238_v22 = vpop.f32.mrf.mxu2 }
 0x340   :  { %v357_v24 = vpop.f32.mrf.mxu2 }
 0x348   :  { %v360_v27 = vpop.f32.mrf.mxu2 }
 0x34c   :  { %v479_v25 = vpop.f32.mrf.mxu1 }
 0x34d   :  { %617 = vrot.lane.b32.xlu1 %v479_v25, %s1832_s18 }
 0x352   :  { %v601_v26 = vpop.f32.mrf.mxu2 }
 0x353   :  { %625 = vrot.lane.b32.xlu2 %v601_v26, %s1833_s19 }
 0x354   :  { %v482_v28 = vpop.f32.mrf.mxu1 }
 0x355   :  { %619 = vrot.lane.b32.xlu0 %v482_v28, %s1832_s18  ;;  %609 = vrot.lane.b32.xlu1 %v357_v24, %s1819_s24 }
 0x35d   :  { %611 = vrot.lane.b32.xlu1 %v360_v27, %s1819_s24  ;;  %v2081_v27 = vld [vmem:[#allocation5 + $0x98] sm:$0xff] }
 0x361   :  { %v604_v29 = vpop.f32.mrf.mxu2 }
 0x362   :  { %627 = vrot.lane.b32.xlu2 %v604_v29, %s1833_s19 }
 0x3ad   :  { %v626_v38 = vpop.permute.xlu2 %625 }
 0x3bc   :  { %v628_v44 = vpop.permute.xlu2 %627 }
 0x3bf   :  { %v618_v36 = vpop.permute.xlu1 %617 }
 0x3c7   :  { %v610_v11 = vpop.permute.xlu1 %609  ;;  %v620_v42 = vpop.permute.xlu0 %619 }
 0x3c8   :  { %v631_v37 = vsel %vm125_vm1, %v235_v21, %v610_v11 }
 0x3c9   :  { %v633_v39 = vsel %vm157_vm2, %v631_v37, %v618_v36  ;;  %v721_v36 = vperm.slane %v2081_v27, 0 }
 0x3ca   :  { %v636_v40 = vsel %vm635_vm9, %v633_v39, %v626_v38  ;;  %v724_v39 = vperm.slane %v2081_v27, 3 }
 0x3cb   :  { %1551 = vmatmul.msk.f32.vlgmr.msra.gmra.mxu0 %vm89_vm0, %v636_v40 }
 0x3cf   :  { %v612_v41 = vpop.permute.xlu1 %611 }
 0x3d0   :  { %v632_v43 = vsel %vm125_vm1, %v238_v22, %v612_v41 }
 0x3d1   :  { %v634_v45 = vsel %vm157_vm2, %v632_v43, %v620_v42 }
 0x3d2   :  { %v637_v46 = vsel %vm635_vm9, %v634_v45, %v628_v44 }
 0x3d3   :  { %1552 = vmatmul.msk.f32.gmra.mxu0 %vm89_vm0, %v637_v46 }
 0x448   :  { %v662_v48 = vpop.f32.mrf.mxu0 }
 0x449   :  { %v663_v49 = vadd.f32 %v662_v48, %v2065_v47 }
 0x44b   :  { %v668_v50 = vadd.f32 %v663_v49, %v1876_v4  ;;  %v2073_v4 = vsel %vm681_vm10, %v1693_v57, %v680_v63  ;;  %v52_v49 = vld [vmem:[%s2278_s0 + $0x10] sm:$0xff] }
 0x44d   :  { %v670_v51 = vsel %vm89_vm0, %v668_v50, 0.0 }
 0x44e   :  { %671 = vadd.xlane.f32.xlu1 %v670_v51 }
 0x450   :  { %v665_v52 = vpop.f32.mrf.mxu0 }
 0x451   :  { %v666_v53 = vadd.f32 %v665_v52, %v2065_v47 }
 0x453   :  { %v669_v54 = vadd.f32 %v666_v53, %v1881_v5  ;;  %v67_v53 = vld [vmem:[#allocation2 + $0x48] sm:$0xff] }
 0x455   :  { %v673_v55 = vsel %vm89_vm0, %v669_v54, 0.0 }
 0x456   :  { %674 = vadd.xlane.f32.xlu2 %v673_v55 }
 0x4c1   :  { %v672_v0 = vpop.xlane.xlu1 %671 }
 0x4c2   :  { %v683_v58 = vmul.f32 %v2073_v4, %v672_v0 }
 0x4c4   :  { %v685_v1 = vsub.f32 %v668_v50, %v683_v58  ;;  %v53_v50 = vld [vmem:[%s2278_s0 + $0x18] sm:$0xff] }
 0x4c6   :  { %v687_v2 = vmul.f32 %v685_v1, %v685_v1 }
 0x4c8   :  { %v689_v5 = vsel %vm89_vm0, %v687_v2, 0.0 }
 0x4c9   :  { %690 = vadd.xlane.f32.xlu0 %v689_v5  ;;  %v675_v3 = vpop.xlane.xlu2 %674 }
 0x4ca   :  { %v684_v6 = vmul.f32 %v2073_v4, %v675_v3 }
 0x4cc   :  { %v686_v7 = vsub.f32 %v669_v54, %v684_v6  ;;  %v727_v54 = vperm.slane %v67_v53, 0 }
 0x4ce   :  { %v688_v9 = vmul.f32 %v686_v7, %v686_v7 }
 0x4d0   :  { %v692_v10 = vsel %vm89_vm0, %v688_v9, 0.0 }
 0x4d1   :  { %693 = vadd.xlane.f32.xlu1 %v692_v10 }
 0x53c   :  { %v691_v61 = vpop.xlane.xlu0 %690 }
 0x53d   :  { %v695_v14 = vmul.f32 %v691_v61, %v2073_v4 }
 0x53f   :  { %v697_v15 = vadd.f32 1e-05, %v695_v14 }
 0x541   :  { %1694 = vrsqrt.f32 %v697_v15  ;;  %vm705_vm12 = vweird.f32 %v697_v15 }
 0x544   :  { %v694_v16 = vpop.xlane.xlu1 %693 }
 0x545   :  { %v696_v18 = vmul.f32 %v694_v16, %v2073_v4 }
 0x547   :  { %v1695_v19 = vpop.eup %1694  ;;  %v698_v20 = vadd.f32 1e-05, %v696_v18 }
 0x548   :  { %v700_v21 = vmul.f32 %v1695_v19, %v697_v15  ;;  %vm706_vm11 = vweird.f32 %v1695_v19  ;;  %v2143_v15 = vld [vmem:[%s2279_s1 + $0x18] sm:$0xff]  ;;  %s1835_s1 = smov [#allocation7]  }
 0x549   :  { %1696 = vrsqrt.f32 %v698_v20  ;;  %vm707_vm13 = vmor %vm705_vm12, %vm706_vm11  ;;  %vm715_vm15 = vweird.f32 %v698_v20  ;;  %s1509_s27 = sshll.u32 %s1835_s1, 4  ;;  %s1510_s27 = int_to_ptr.vmem [resolvable:$true] %s1509_s27 }
 0x54a   :  { %v701_v22 = vmul.f32 %v1695_v19, %v700_v21 }
 0x54c   :  { %v702_v24 = vmul.f32 0.5, %v701_v22 }
 0x54e   :  { %v703_v25 = vsub.f32 1.5, %v702_v24 }
 0x54f   :  { %v1697_v26 = vpop.eup %1696 }
 0x550   :  { %v704_v28 = vmul.f32 %v1695_v19, %v703_v25  ;;  %v710_v29 = vmul.f32 %v1697_v26, %v698_v20  ;;  %vm716_vm14 = vweird.f32 %v1697_v26 }
 0x551   :  { %vm717_vm3 = vmor %vm715_vm15, %vm716_vm14 }
 0x552   :  { %v708_v11 = vsel %vm707_vm13, %v1695_v19, %v704_v28  ;;  %v711_v37 = vmul.f32 %v1697_v26, %v710_v29 }
 0x553   :  { %v719_v38 = vmul.f32 %v708_v11, %v685_v1 }
 0x554   :  { %v712_v40 = vmul.f32 0.5, %v711_v37 }
 0x555   :  { %v722_v41 = vmul.f32 %v721_v36, %v719_v38 }
 0x556   :  { %v713_v42 = vsub.f32 1.5, %v712_v40 }
 0x557   :  { %v2085_v43 = vadd.f32 %v724_v39, %v722_v41 }
 0x558   :  { %v714_v44 = vmul.f32 %v1697_v26, %v713_v42 }
 0x559   :  { %1553 = vmatmul.msk.f32.vlgmr.msra.gmra.mxu1 %vm89_vm0, %v2085_v43 }
 0x55a   :  { %v718_v45 = vsel %vm717_vm3, %v1697_v26, %v714_v44 }
 0x55b   :  { %v720_v46 = vmul.f32 %v718_v45, %v686_v7 }
 0x55d   :  { %v723_v17 = vmul.f32 %v721_v36, %v720_v46 }
 0x55f   :  { %v2089_v48 = vadd.f32 %v724_v39, %v723_v17 }
 0x561   :  { %1554 = vmatmul.msk.f32.gmra.mxu1 %vm89_vm0, %v2089_v48 }
 0x569   :  { %1555 = vmatmul.msk.f32.gmra.mxu1 %vm89_vm0, %v52_v49 }
 0x571   :  { %1556 = vmatmul.msk.f32.gmra.mxu1 %vm89_vm0, %v53_v50 }
 0x5d6   :  { %v757_v51 = vpop.f32.mrf.mxu1 }
 0x5d7   :  { %v758_v62 = vadd.f32 %v757_v51, %v727_v54 }
 0x5de   :  { %v760_v52 = vpop.f32.mrf.mxu1 }
 0x5df   :  { %v761_v63 = vadd.f32 %v760_v52, %v727_v54 }
 0x5e6   :  { %v763_v55 = vpop.f32.mrf.mxu1 }
 0x5e7   :  { %v2101_v56 = vadd.f32 %v763_v55, %v727_v54 }
 0x5e9   :  { %1017 = vrot.lane.b32.xlu0 %v2101_v56, %s1826_s8  ;;  %771 = vrot.lane.b32.xlu1 %v2101_v56, %s1823_s5 }
 0x5ee   :  { %v766_v57 = vpop.f32.mrf.mxu1 }
 0x5ef   :  { %v767_v59 = vadd.f32 %v766_v57, %v727_v54 }
 0x5f1   :  { %895 = vrot.lane.b32.xlu1 %v2101_v56, %s1822_s30  ;;  %v2110_v60 = vpack.i.bf16 %v2101_v56, %v767_v59  ;;  %773 = vrot.lane.b32.xlu2 %v767_v59, %s1823_s5 }
 0x5f3   :  { %1631 = vrot.lane.b32.xlu0 %v2110_v60, %s1829_s15 }
 0x5f9   :  { %891 = vrot.lane.b32.xlu1 %v758_v62, %s1821_s29 }
 0x5fb   :  { %1019 = vrot.lane.b32.xlu0 %v767_v59, %s1826_s8 }
 0x601   :  { %897 = vrot.lane.b32.xlu1 %v767_v59, %s1822_s30  ;;  %s1511_s30 = sshll.u32 %s2282_s4, 4  ;;  %s1512_s30 = int_to_ptr.hbm [resolvable:$true] %s1511_s30 }
 0x609   :  { %893 = vrot.lane.b32.xlu1 %v761_v63, %s1821_s29 }
 0x611   :  { %1141 = vrot.lane.b32.xlu1 %v767_v59, %s1825_s7 }
 0x619   :  { %1013 = vrot.lane.b32.xlu1 %v758_v62, %s1827_s9 }
 0x621   :  { %1015 = vrot.lane.b32.xlu1 %v761_v63, %s1827_s9 }
 0x64b   :  { %v774_v0 = vpop.permute.xlu2 %773 }
 0x64c   :  { %1557 = vmatpush.xpose.msk.msrb.mxu3 %vm125_vm1, %v774_v0 }
 0x65b   :  { %v772_v58 = vpop.permute.xlu1 %771  ;;  %v1018_v1 = vpop.permute.xlu0 %1017 }
 0x65c   :  { %1558 = vmatpush.xpose.msk.msrb.mxu3 %vm125_vm1, %v772_v58 }
 0x65f   :  { %1559 = vmatmul.msk.f32.vlgmr.msrb.gmra.mxu3 %vm125_vm1, %v758_v62 }
 0x663   :  { %v896_v2 = vpop.permute.xlu1 %895 }
 0x665   :  { %v1632_v5 = vpop.permute.xlu0 %1631 }
 0x666   :  { %v1633_v3 = vunpack.i.l.bf16 %v1632_v5  ;;  %v1634_v6 = vunpack.i.h.bf16 %v1632_v5 }
 0x667   :  { %1560 = vmatmul.msk.f32.gmra.mxu3 %vm125_vm1, %v761_v63 }
 0x668   :  { %882 = vmatpush.msrb.mxu2 %v1633_v3 }
 0x66a   :  { %883 = vmatpush.msrb.mxu2 %v1634_v6 }
 0x66b   :  { %v892_v7 = vpop.permute.xlu1 %891 }
 0x66d   :  { %v1020_v9 = vpop.permute.xlu0 %1019 }
 0x66e   :  { %1569 = vmatpush.xpose.msk.msra.mxu2 %vm125_vm1, %v1020_v9 }
 0x672   :  { %1570 = vmatpush.xpose.msk.msra.mxu2 %vm125_vm1, %v1018_v1 }
 0x673   :  { %v898_v10 = vpop.permute.xlu1 %897 }
 0x674   :  { %1563 = vmatpush.xpose.msk.msrb.mxu0 %vm125_vm1, %v898_v10 }
 0x678   :  { %1564 = vmatpush.xpose.msk.msrb.mxu0 %vm125_vm1, %v896_v2 }
 0x67b   :  { %1565 = vmatmul.msk.f32.vlgmr.msrb.gmra.mxu0 %vm125_vm1, %v892_v7  ;;  %v894_v8 = vpop.permute.xlu1 %893 }
 0x683   :  { %1566 = vmatmul.msk.f32.gmra.mxu0 %vm125_vm1, %v894_v8  ;;  %v1142_v12 = vpop.permute.xlu1 %1141 }
 0x684   :  { %1575 = vmatpush.xpose.msk.msrb.mxu1 %vm125_vm1, %v1142_v12 }
 0x68b   :  { %v1014_v12 = vpop.permute.xlu1 %1013 }
 0x6e2   :  { %v802_v23 = vpop.f32.mrf.mxu3 }
 0x6e3   :  { %v803_v61 = vadd.f32 %v802_v23, %v2136_v13  ;;  %v1016_v23 = vpop.permute.xlu1 %1015 }
 0x6e5   :  { %v808_v14 = vsel %vm157_vm2, %v803_v61, -inf }
 0x6e6   :  { %809 = vmax.xlane.f32.xlu0 %v808_v14 }
 0x6ea   :  { %v805_v16 = vpop.f32.mrf.mxu3 }
 0x6eb   :  { %v806_v18 = vadd.f32 %v805_v16, %v2143_v15 }
 0x6ed   :  { %v811_v19 = vsel %vm157_vm2, %v806_v18, -inf }
 0x6ee   :  { %812 = vmax.xlane.f32.xlu0 %v811_v19 }
 0x6f8   :  { %v924_v20 = vpop.f32.mrf.mxu0 }
 0x6f9   :  { %v2148_v21 = vadd.f32 %v924_v20, %v2136_v13 }
 0x6fb   :  { %v930_v22 = vsel %vm157_vm2, %v2148_v21, -inf }
 0x6fc   :  { %931 = vmax.xlane.f32.xlu1 %v930_v22 }
 0x700   :  { %v927_v40 = vpop.f32.mrf.mxu0 }
 0x701   :  { %v928_v41 = vadd.f32 %v927_v40, %v2143_v15 }
 0x702   :  { %1135 = vrot.lane.b32.xlu0 %v758_v62, %s1824_s6 }
 0x703   :  { %v933_v42 = vsel %vm157_vm2, %v928_v41, -inf }
 0x759   :  { %v810_v24 = vpop.xlane.xlu0 %809 }
 0x75a   :  { %v814_v25 = vsub.f32 %v803_v61, %v810_v24 }
 0x75c   :  { %v816_v26 = vmul.f32 1.442695, %v814_v25 }
 0x75e   :  { %1698 = vpow2.f32 %v816_v26 }
 0x761   :  { %v813_v28 = vpop.xlane.xlu0 %812 }
 0x762   :  { %v815_v29 = vsub.f32 %v806_v18, %v813_v28 }
 0x764   :  { %v1699_v36 = vpop.eup %1698  ;;  %v818_v11 = vmul.f32 1.442695, %v815_v29 }
 0x765   :  { %v820_v37 = vsel %vm157_vm2, %v1699_v36, 0.0 }
 0x766   :  { %1700 = vpow2.f32 %v818_v11  ;;  %821 = vadd.xlane.f32.xlu2 %v820_v37 }
 0x76c   :  { %v1701_v38 = vpop.eup %1700 }
 0x76d   :  { %v823_v39 = vsel %vm157_vm2, %v1701_v38, 0.0 }
 0x76e   :  { %824 = vadd.xlane.f32.xlu0 %v823_v39 }
 0x76f   :  { %v932_v28 = vpop.xlane.xlu1 %931 }
 0x770   :  { %v936_v11 = vsub.f32 %v2148_v21, %v932_v28 }
 0x774   :  { %v1136_v44 = vpop.permute.xlu0 %1135 }
 0x77e   :  { %1139 = vrot.lane.b32.xlu2 %v2101_v56, %s1825_s7 }
 0x782   :  { %1137 = vrot.lane.b32.xlu0 %v761_v63, %s1824_s6 }
 0x7ac   :  { %934 = vmax.xlane.f32.xlu0 %v933_v42 }
 0x7d9   :  { %v822_v45 = vpop.xlane.xlu2 %821 }
 0x7da   :  { %1702 = vrcp.f32 %v822_v45  ;;  %v837_v52 = vand.u32 2147483648, %v822_v45  ;;  %v835_v54 = vand.u32 2147483647, %v822_v45  ;;  %vm831_vm5 = vweird.f32 %v822_v45 }
 0x7dc   :  { %v838_v57 = vor.u32 1.1754944e-38, %v837_v52  ;;  %vm836_vm7 = vcmp.eq.f32.partialorder %v835_v54, 8.507059e+37 }
 0x7e0   :  { %v1703_v46 = vpop.eup %1702 }
 0x7e1   :  { %v827_v17 = vmul.f32 %v1703_v46, %v822_v45  ;;  %v1140_v49 = vpop.permute.xlu2 %1139  ;;  %v825_v50 = vpop.xlane.xlu0 %824  ;;  %vm832_vm4 = vweird.f32 %v1703_v46 }
 0x7e2   :  { %1704 = vrcp.f32 %v825_v50  ;;  %1576 = vmatpush.xpose.msk.msrb.mxu1 %vm125_vm1, %v1140_v49  ;;  %vm833_vm6 = vmor %vm831_vm5, %vm832_vm4  ;;  %v851_v1 = vand.u32 2147483648, %v825_v50  ;;  %v849_v5 = vand.u32 2147483647, %v825_v50  ;;  %vm845_vm10 = vweird.f32 %v825_v50 }
 0x7e3   :  { %v828_v51 = vsub.f32 1.0, %v827_v17 }
 0x7e4   :  { %v852_v6 = vor.u32 1.1754944e-38, %v851_v1  ;;  %vm850_vm12 = vcmp.eq.f32.partialorder %v849_v5, 8.507059e+37 }
 0x7e5   :  { %v829_v53 = vmul.f32 %v1703_v46, %v828_v51  ;;  %1577 = vmatmul.msk.f32.vlgmr.msrb.gmra.mxu1 %vm125_vm1, %v1136_v44 }
 0x7e7   :  { %v830_v55 = vadd.f32 %v1703_v46, %v829_v53 }
 0x7e8   :  { %v1705_v56 = vpop.eup %1704 }
 0x7e9   :  { %v834_v59 = vsel %vm833_vm6, %v1703_v46, %v830_v55  ;;  %v841_v62 = vmul.f32 %v1705_v56, %v825_v50  ;;  %vm846_vm8 = vweird.f32 %v1705_v56 }
 0x7ea   :  { %v839_v63 = vsel %vm836_vm7, %v838_v57, %v834_v59  ;;  %vm847_vm11 = vmor %vm845_vm10, %vm846_vm8 }
 0x7eb   :  { %v842_v0 = vsub.f32 1.0, %v841_v62  ;;  %v854_v58 = vmul.f32 %v1699_v36, %v839_v63 }
 0x7ed   :  { %v843_v2 = vmul.f32 %v1705_v56, %v842_v0  ;;  %1561 = vmatmul.msk.f32.vlgmr.msrb.gmra.mxu2 %vm157_vm2, %v854_v58 }
 0x7ef   :  { %v844_v3 = vadd.f32 %v1705_v56, %v843_v2 }
 0x7f1   :  { %v848_v7 = vsel %vm847_vm11, %v1705_v56, %v844_v3 }
 0x7f2   :  { %v853_v9 = vsel %vm850_vm12, %v852_v6, %v848_v7 }
 0x7f3   :  { %v855_v10 = vmul.f32 %v1701_v38, %v853_v9  ;;  %v938_v38 = vmul.f32 1.442695, %v936_v11 }
 0x7f4   :  { %v1138_v8 = vpop.permute.xlu0 %1137 }
 0x7f5   :  { %1562 = vmatmul.msk.f32.gmra.mxu2 %vm157_vm2, %v855_v10  ;;  %1578 = vmatmul.msk.f32.gmra.mxu1 %vm125_vm1, %v1138_v8 }
 0x7fd   :  { %1571 = vmatmul.msk.f32.vlgmr.msra.gmra.mxu2 %vm125_vm1, %v1014_v12 }
 0x805   :  { %1572 = vmatmul.msk.f32.gmra.mxu2 %vm125_vm1, %v1016_v23 }
 0x81f   :  { %v935_v18 = vpop.xlane.xlu0 %934 }
 0x820   :  { %v937_v19 = vsub.f32 %v928_v41, %v935_v18 }
 0x822   :  { %v940_v20 = vmul.f32 1.442695, %v937_v19 }
 0x824   :  { %1706 = vpow2.f32 %v940_v20 }
 0x825   :  { %1708 = vpow2.f32 %v938_v38 }
 0x82a   :  { %v2175_v36 = vpop.eup %1706 }
 0x82b   :  { %v945_v37 = vsel %vm157_vm2, %v2175_v36, 0.0  ;;  %v2182_v42 = vpop.eup %1708 }
 0x82c   :  { %v942_v21 = vsel %vm157_vm2, %v2182_v42, 0.0 }
 0x862   :  { %v1168_v61 = vpop.f32.mrf.mxu1 }
 0x863   :  { %v1169_v14 = vadd.f32 %v1168_v61, %v2136_v13 }
 0x865   :  { %v1174_v16 = vsel %vm157_vm2, %v1169_v14, -inf }
 0x866   :  { %1175 = vmax.xlane.f32.xlu2 %v1174_v16 }
 0x870   :  { %v2169_v22 = vpop.f32.mrf.mxu2 }
 0x872   :  { %v1171_v24 = vpop.f32.mrf.mxu1 }
 0x873   :  { %v1172_v25 = vadd.f32 %v1171_v24, %v2143_v15 }
 0x875   :  { %v1177_v26 = vsel %vm157_vm2, %v1172_v25, -inf }
 0x876   :  { %1178 = vmax.xlane.f32.xlu0 %v1177_v26 }
 0x878   :  { %v2173_v29 = vpop.f32.mrf.mxu2 }
 0x87e   :  { %946 = vadd.xlane.f32.xlu0 %v945_v37 }
 0x880   :  { %v1046_v39 = vpop.f32.mrf.mxu2 }
 0x881   :  { %v1047_v40 = vadd.f32 %v1046_v39, %v2136_v13 }
 0x883   :  { %v1052_v41 = vsel %vm157_vm2, %v1047_v40, -inf }
 0x884   :  { %1053 = vmax.xlane.f32.xlu1 %v1052_v41 }
 0x888   :  { %v1049_v44 = vpop.f32.mrf.mxu2 }
 0x889   :  { %v1050_v45 = vadd.f32 %v1049_v44, %v2143_v15 }
 0x88b   :  { %v1055_v46 = vsel %vm157_vm2, %v1050_v45, -inf }
 0x88c   :  { %1056 = vmax.xlane.f32.xlu2 %v1055_v46  ;;  %943 = vadd.xlane.f32.xlu1 %v942_v21 }
 0x8a5   :  { %1636 = vrot.lane.b32.xlu1 %v2110_v60, %s1828_s14 }
 0x8ad   :  { %1651 = vrot.lane.b32.xlu1 %v1650_v32, %s1823_s5 }
 0x8d9   :  { %v1176_v13 = vpop.xlane.xlu2 %1175 }
 0x8da   :  { %v1180_v17 = vsub.f32 %v1169_v14, %v1176_v13 }
 0x8dc   :  { %v1182_v49 = vmul.f32 1.442695, %v1180_v17 }
 0x8de   :  { %1710 = vpow2.f32 %v1182_v49 }
 0x8e4   :  { %v2194_v15 = vpop.eup %1710 }
 0x8e5   :  { %v1186_v50 = vsel %vm157_vm2, %v2194_v15, 0.0 }
 0x8e6   :  { %1187 = vadd.xlane.f32.xlu2 %v1186_v50 }
 0x8e9   :  { %v1179_v51 = vpop.xlane.xlu0 %1178 }
 0x8ea   :  { %v1181_v52 = vsub.f32 %v1172_v25, %v1179_v51 }
 0x8ec   :  { %v1184_v53 = vmul.f32 1.442695, %v1181_v52 }
 0x8ee   :  { %1712 = vpow2.f32 %v1184_v53 }
 0x8f1   :  { %v947_v59 = vpop.xlane.xlu0 %946 }
 0x8f2   :  { %v973_v26 = vand.u32 2147483648, %v947_v59  ;;  %vm967_vm5 = vweird.f32 %v947_v59  ;;  %v971_v37 = vand.u32 2147483647, %v947_v59 }
 0x8f4   :  { %v2198_v54 = vpop.eup %1712  ;;  %v974_v33 = vor.u32 1.1754944e-38, %v973_v26  ;;  %vm972_vm7 = vcmp.eq.f32.partialorder %v971_v37, 8.507059e+37 }
 0x8f5   :  { %v1189_v30 = vsel %vm157_vm2, %v2198_v54, 0.0 }
 0x8f6   :  { %1190 = vadd.xlane.f32.xlu2 %v1189_v30 }
 0x8f7   :  { %v1054_v31 = vpop.xlane.xlu1 %1053 }
 0x8f8   :  { %v1058_v32 = vsub.f32 %v1047_v40, %v1054_v31 }
 0x8fa   :  { %v1060_v55 = vmul.f32 1.442695, %v1058_v32 }
 0x8fc   :  { %1714 = vpow2.f32 %v1060_v55 }
 0x8ff   :  { %v1057_v56 = vpop.xlane.xlu2 %1056  ;;  %v944_v57 = vpop.xlane.xlu1 %943 }
 0x900   :  { %v1059_v62 = vsub.f32 %v1050_v45, %v1057_v56  ;;  %1716 = vrcp.f32 %v944_v57  ;;  %v959_v23 = vand.u32 2147483648, %v944_v57  ;;  %vm953_vm14 = vweird.f32 %v944_v57 }
 0x901   :  { %1718 = vrcp.f32 %v947_v59  ;;  %v957_v61 = vand.u32 2147483647, %v944_v57 }
 0x902   :  { %v2202_v63 = vpop.eup %1714  ;;  %v1062_v0 = vmul.f32 1.442695, %v1059_v62  ;;  %v960_v18 = vor.u32 1.1754944e-38, %v959_v23 }
 0x903   :  { %v1064_v58 = vsel %vm157_vm2, %v2202_v63, 0.0  ;;  %vm958_vm3 = vcmp.eq.f32.partialorder %v957_v61, 8.507059e+37 }
 0x904   :  { %1720 = vpow2.f32 %v1062_v0  ;;  %1065 = vadd.xlane.f32.xlu0 %v1064_v58 }
 0x906   :  { %v1717_v1 = vpop.eup %1716 }
 0x907   :  { %v949_v2 = vmul.f32 %v1717_v1, %v944_v57  ;;  %v1719_v5 = vpop.eup %1718  ;;  %vm954_vm13 = vweird.f32 %v1717_v1 }
 0x908   :  { %v963_v9 = vmul.f32 %v1719_v5, %v947_v59  ;;  %vm955_vm15 = vmor %vm953_vm14, %vm954_vm13  ;;  %vm968_vm4 = vweird.f32 %v1719_v5 }
 0x909   :  { %v950_v3 = vsub.f32 1.0, %v949_v2  ;;  %vm969_vm6 = vmor %vm967_vm5, %vm968_vm4 }
 0x90a   :  { %v2206_v6 = vpop.eup %1720  ;;  %v964_v8 = vsub.f32 1.0, %v963_v9 }
 0x90b   :  { %v1067_v7 = vsel %vm157_vm2, %v2206_v6, 0.0  ;;  %v951_v10 = vmul.f32 %v1717_v1, %v950_v3 }
 0x90c   :  { %1068 = vadd.xlane.f32.xlu0 %v1067_v7  ;;  %v965_v14 = vmul.f32 %v1719_v5, %v964_v8 }
 0x90d   :  { %v952_v12 = vadd.f32 %v1717_v1, %v951_v10 }
 0x90e   :  { %1641 = vrot.lane.b32.xlu2 %v2110_v60, %s1831_s17  ;;  %v966_v25 = vadd.f32 %v1719_v5, %v965_v14 }
 0x90f   :  { %v956_v16 = vsel %vm955_vm15, %v1717_v1, %v952_v12 }
 0x910   :  { %v961_v20 = vsel %vm958_vm3, %v960_v18, %v956_v16  ;;  %v970_v38 = vsel %vm969_vm6, %v1719_v5, %v966_v25 }
 0x911   :  { %v976_v11 = vmul.f32 %v2182_v42, %v961_v20  ;;  %v975_v34 = vsel %vm972_vm7, %v974_v33, %v970_v38 }
 0x916   :  { %1656 = vrot.lane.b32.xlu2 %v1655_v35, %s1823_s5  ;;  %v977_v35 = vmul.f32 %v2175_v36, %v975_v34 }
 0x917   :  { %v1637_v19 = vpop.permute.xlu1 %1636 }
 0x918   :  { %v1638_v24 = vunpack.i.l.bf16 %v1637_v19  ;;  %v1639_v28 = vunpack.i.h.bf16 %v1637_v19 }
 0x91a   :  { %1004 = vmatpush.msra.mxu3 %v1638_v24 }
 0x91c   :  { %1005 = vmatpush.msra.mxu3 %v1639_v28 }
 0x91d   :  { %1567 = vmatmul.msk.f32.vlgmr.msra.gmra.mxu3 %vm157_vm2, %v976_v11 }
 0x920   :  { %1646 = vrot.lane.b32.xlu0 %v2110_v60, %s1830_s16 }
 0x925   :  { %1568 = vmatmul.msk.f32.gmra.mxu3 %vm157_vm2, %v977_v35 }
 0x959   :  { %v1188_v39 = vpop.xlane.xlu2 %1187 }
 0x95a   :  { %1722 = vrcp.f32 %v1188_v39  ;;  %v1203_v21 = vand.u32 2147483648, %v1188_v39  ;;  %vm1197_vm10 = vweird.f32 %v1188_v39  ;;  %v1201_v13 = vand.u32 2147483647, %v1188_v39 }
 0x95c   :  { %v1204_v49 = vor.u32 1.1754944e-38, %v1203_v21  ;;  %vm1202_vm12 = vcmp.eq.f32.partialorder %v1201_v13, 8.507059e+37 }
 0x960   :  { %v1723_v40 = vpop.eup %1722 }
 0x961   :  { %v1193_v41 = vmul.f32 %v1723_v40, %v1188_v39  ;;  %vm1198_vm8 = vweird.f32 %v1723_v40 }
 0x962   :  { %vm1199_vm11 = vmor %vm1197_vm10, %vm1198_vm8 }
 0x963   :  { %v1194_v42 = vsub.f32 1.0, %v1193_v41 }
 0x965   :  { %v1195_v44 = vmul.f32 %v1723_v40, %v1194_v42 }
 0x967   :  { %v1196_v46 = vadd.f32 %v1723_v40, %v1195_v44 }
 0x969   :  { %v1191_v45 = vpop.xlane.xlu2 %1190  ;;  %v1200_v60 = vsel %vm1199_vm11, %v1723_v40, %v1196_v46 }
 0x96a   :  { %1724 = vrcp.f32 %v1191_v45  ;;  %v1205_v51 = vsel %vm1202_vm12, %v1204_v49, %v1200_v60  ;;  %v1217_v30 = vand.u32 2147483648, %v1191_v45  ;;  %v1215_v56 = vand.u32 2147483647, %v1191_v45 }
 0x96b   :  { %v1220_v55 = vmul.f32 %v2194_v15, %v1205_v51  ;;  %vm1211_vm14 = vweird.f32 %v1191_v45 }
 0x96c   :  { %v1218_v62 = vor.u32 1.1754944e-38, %v1217_v30  ;;  %vm1216_vm3 = vcmp.eq.f32.partialorder %v1215_v56, 8.507059e+37 }
 0x970   :  { %v1725_v17 = vpop.eup %1724 }
 0x971   :  { %v1207_v36 = vmul.f32 %v1725_v17, %v1191_v45  ;;  %v1642_v50 = vpop.permute.xlu2 %1641  ;;  %vm1212_vm13 = vweird.f32 %v1725_v17 }
 0x972   :  { %v1643_v52 = vunpack.i.l.bf16 %v1642_v50  ;;  %v1644_v31 = vunpack.i.h.bf16 %v1642_v50  ;;  %vm1213_vm15 = vmor %vm1211_vm14, %vm1212_vm13 }
 0x973   :  { %v1208_v53 = vsub.f32 1.0, %v1207_v36 }
 0x974   :  { %1248 = vmatpush.msrb.mxu3 %v1643_v52 }
 0x975   :  { %v1209_v32 = vmul.f32 %v1725_v17, %v1208_v53 }
 0x976   :  { %1249 = vmatpush.msrb.mxu3 %v1644_v31 }
 0x977   :  { %1579 = vmatmul.msk.f32.vlgmr.msrb.gmra.mxu3 %vm157_vm2, %v1220_v55  ;;  %v1066_v57 = vpop.xlane.xlu0 %1065  ;;  %v1210_v59 = vadd.f32 %v1725_v17, %v1209_v32 }
 0x978   :  { %1726 = vrcp.f32 %v1066_v57  ;;  %v1081_v23 = vand.u32 2147483648, %v1066_v57  ;;  %vm1075_vm5 = vweird.f32 %v1066_v57  ;;  %v1079_v61 = vand.u32 2147483647, %v1066_v57 }
 0x979   :  { %v1214_v0 = vsel %vm1213_vm15, %v1725_v17, %v1210_v59  ;;  %v1657_v42 = vpop.permute.xlu2 %1656 }
 0x97a   :  { %v1219_v58 = vsel %vm1216_vm3, %v1218_v62, %v1214_v0  ;;  %vm1080_vm7 = vcmp.eq.f32.partialorder %v1079_v61, 8.507059e+37  ;;  %v1658_v44 = vunpack.i.l.bf16 %v1657_v42  ;;  %v1659_v45 = vunpack.i.h.bf16 %v1657_v42  ;;  %v73_v61 = vld [vmem:[#allocation5 + $0x28] sm:$0xff] }
 0x97b   :  { %v1221_v1 = vmul.f32 %v2198_v54, %v1219_v58  ;;  %v1082_v54 = vor.u32 1.1754944e-38, %v1081_v23  ;;  %v74_v23 = vld [vmem:[#allocation5 + $0x30] sm:$0xff]  ;;  %vm1421_vm3 = vcmask 523264  }
 0x97e   :  { %v1727_v2 = vpop.eup %1726 }
 0x97f   :  { %1580 = vmatmul.msk.f32.gmra.mxu3 %vm157_vm2, %v1221_v1  ;;  %v1069_v15 = vpop.xlane.xlu0 %1068  ;;  %v1071_v5 = vmul.f32 %v1727_v2, %v1066_v57  ;;  %vm1076_vm4 = vweird.f32 %v1727_v2 }
 0x980   :  { %1728 = vrcp.f32 %v1069_v15  ;;  %vm1077_vm6 = vmor %vm1075_vm5, %vm1076_vm4  ;;  %v1095_v25 = vand.u32 2147483648, %v1069_v15  ;;  %vm1089_vm10 = vweird.f32 %v1069_v15  ;;  %v1093_v11 = vand.u32 2147483647, %v1069_v15 }
 0x981   :  { %v1072_v3 = vsub.f32 1.0, %v1071_v5 }
 0x982   :  { %v1096_v38 = vor.u32 1.1754944e-38, %v1095_v25  ;;  %vm1094_vm12 = vcmp.eq.f32.partialorder %v1093_v11, 8.507059e+37 }
 0x983   :  { %v1073_v9 = vmul.f32 %v1727_v2, %v1072_v3 }
 0x985   :  { %v1074_v8 = vadd.f32 %v1727_v2, %v1073_v9 }
 0x986   :  { %v1729_v7 = vpop.eup %1728 }
 0x987   :  { %v1085_v10 = vmul.f32 %v1729_v7, %v1069_v15  ;;  %v1078_v14 = vsel %vm1077_vm6, %v1727_v2, %v1074_v8  ;;  %vm1090_vm8 = vweird.f32 %v1729_v7 }
 0x988   :  { %v1083_v19 = vsel %vm1080_vm7, %v1082_v54, %v1078_v14  ;;  %vm1091_vm11 = vmor %vm1089_vm10, %vm1090_vm8 }
 0x989   :  { %v1086_v12 = vsub.f32 1.0, %v1085_v10  ;;  %v1098_v28 = vmul.f32 %v2202_v63, %v1083_v19  ;;  %v1652_v63 = vpop.permute.xlu1 %1651  ;;  %v84_v19 = vld [vmem:[#allocation5 + $0x80] sm:$0xff] }
 0x98a   :  { %v1654_v40 = vunpack.i.h.bf16 %v1652_v63  ;;  %v1653_v41 = vunpack.i.l.bf16 %v1652_v63 }
 0x98b   :  { %v1087_v16 = vmul.f32 %v1729_v7, %v1086_v12  ;;  %v75_v12 = vld [vmem:[#allocation5 + $0x38] sm:$0xff] }
 0x98c   :  { %1325 = vmatpush.msrb.mxu2 %v1653_v41  ;;  %v1382_v41 = vperm.slane %v2081_v27, 1 }
 0x98d   :  { %v1088_v24 = vadd.f32 %v1729_v7, %v1087_v16 }
 0x98e   :  { %1326 = vmatpush.msrb.mxu2 %v1654_v40 }
 0x98f   :  { %v1092_v37 = vsel %vm1091_vm11, %v1729_v7, %v1088_v24 }
 0x990   :  { %v1097_v33 = vsel %vm1094_vm12, %v1096_v38, %v1092_v37  ;;  %1327 = vmatpush.msrb.mxu2 %v1658_v44  ;;  %v81_v37 = vld [vmem:[#allocation5 + $0x68] sm:$0xff] }
 0x991   :  { %v1099_v34 = vmul.f32 %v2206_v6, %v1097_v33 }
 0x992   :  { %v1647_v18 = vpop.permute.xlu0 %1646  ;;  %1328 = vmatpush.msrb.mxu2 %v1659_v45 }
 0x993   :  { %v1648_v20 = vunpack.i.l.bf16 %v1647_v18  ;;  %v1649_v26 = vunpack.i.h.bf16 %v1647_v18  ;;  %v85_v18 = vld [vmem:[#allocation5 + $0x88] sm:$0xff] }
 0x994   :  { %1436 = vmatpush.msra.mxu1 %v85_v18 }
 0x995   :  { %1126 = vmatpush.msra.mxu0 %v1648_v20  ;;  %v83_v20 = vld [vmem:[#allocation5 + $0x78] sm:$0xff] }
 0x996   :  { %1437 = vmatpush.msra.mxu1 %v84_v19 }
 0x997   :  { %1127 = vmatpush.msra.mxu0 %v1649_v26  ;;  %v82_v26 = vld [vmem:[#allocation5 + $0x70] sm:$0xff] }
 0x998   :  { %1573 = vmatmul.msk.f32.vlgmr.msra.gmra.mxu0 %vm157_vm2, %v1098_v28  ;;  %1438 = vmatpush.msra.mxu1 %v83_v20 }
 0x99a   :  { %1439 = vmatpush.msra.mxu1 %v82_v26 }
 0x99c   :  { %1440 = vmatpush.msra.mxu1 %v81_v37 }
 0x9a0   :  { %v1007_v35 = vpop.f32.mrf.mxu3  ;;  %1574 = vmatmul.msk.f32.gmra.mxu0 %vm157_vm2, %v1099_v34 }
 0x9a1   :  { %1259 = vrot.lane.b32.xlu1 %v1007_v35, %s1819_s24 }
 0x9a8   :  { %v1010_v39 = vpop.f32.mrf.mxu3 }
 0x9a9   :  { %1261 = vrot.lane.b32.xlu2 %v1010_v39, %s1819_s24 }
 0x9b1   :  { %1304 = vrot.lane.b32.xlu2 %v2065_v47, %s1823_s5 }
 0x9fa   :  { %v1251_v6 = vpop.f32.mrf.mxu3 }
 0x9fb   :  { %1275 = vrot.lane.b32.xlu1 %v1251_v6, %s1833_s19  ;;  %v1385_v6 = vperm.slane %v2081_v27, 4  ;;  %v78_v27 = vld [vmem:[#allocation5 + $0x50] sm:$0xff] }
 0xa02   :  { %v1254_v46 = vpop.f32.mrf.mxu3 }
 0xa03   :  { %1277 = vrot.lane.b32.xlu1 %v1254_v46, %s1833_s19  ;;  %v1262_v51 = vpop.permute.xlu2 %1261 }
 0xa04   :  { %v1282_v52 = vsel %vm125_vm1, %v2173_v29, %v1262_v51  ;;  %v80_v51 = vld [vmem:[#allocation5 + $0x60] sm:$0xff] }
 0xa05   :  { %1441 = vmatpush.msra.mxu1 %v80_v51 }
 0xa13   :  { %v1260_v13 = vpop.permute.xlu1 %1259 }
 0xa14   :  { %v1281_v17 = vsel %vm125_vm1, %v2169_v22, %v1260_v13  ;;  %v1305_v22 = vpop.permute.xlu2 %1304 }
 0xa15   :  { %v1129_v21 = vpop.f32.mrf.mxu0 }
 0xa16   :  { %1267 = vrot.lane.b32.xlu0 %v1129_v21, %s1832_s18 }
 0xa1d   :  { %v1132_v47 = vpop.f32.mrf.mxu0 }
 0xa1e   :  { %1269 = vrot.lane.b32.xlu0 %v1132_v47, %s1832_s18 }
 0xa6d   :  { %v1276_v60 = vpop.permute.xlu1 %1275 }
 0xa75   :  { %v1278_v30 = vpop.permute.xlu1 %1277 }
 0xa88   :  { %v1268_v49 = vpop.permute.xlu0 %1267 }
 0xa89   :  { %v1283_v36 = vsel %vm157_vm2, %v1281_v17, %v1268_v49 }
 0xa8a   :  { %v1285_v50 = vsel %vm635_vm9, %v1283_v36, %v1276_v60 }
 0xa8b   :  { %1581 = vmatmul.msk.f32.vlgmr.msrb.gmra.mxu2 %vm89_vm0, %v1285_v50 }
 0xa90   :  { %v1270_v53 = vpop.permute.xlu0 %1269 }
 0xa91   :  { %v1284_v31 = vsel %vm157_vm2, %v1282_v52, %v1270_v53  ;;  %v79_v52 = vld [vmem:[#allocation5 + $0x58] sm:$0xff]  ;;  %v77_v53 = vld [vmem:[#allocation5 + $0x48] sm:$0xff] }
 0xa92   :  { %v1286_v32 = vsel %vm635_vm9, %v1284_v31, %v1278_v30  ;;  %1442 = vmatpush.msra.mxu1 %v79_v52  ;;  %v1388_v30 = vperm.slane %v77_v53, 0 }
 0xa93   :  { %1582 = vmatmul.msk.f32.gmra.mxu2 %vm89_vm0, %v1286_v32 }
 0xa94   :  { %1443 = vmatpush.msra.mxu1 %v78_v27 }
 0xb0e   :  { %v1330_v55 = vpop.f32.mrf.mxu2 }
 0xb0f   :  { %v1331_v56 = vadd.f32 %v1330_v55, %v1305_v22 }
 0xb11   :  { %v1336_v57 = vadd.f32 %v1331_v56, %v2085_v43 }
 0xb13   :  { %v1338_v59 = vsel %vm89_vm0, %v1336_v57, 0.0 }
 0xb14   :  { %1339 = vadd.xlane.f32.xlu0 %v1338_v59  ;;  %v86_v59 = vld [vmem:[#allocation5 + $0x90] sm:$0xff] }
 0xb16   :  { %v1333_v62 = vpop.f32.mrf.mxu2 }
 0xb17   :  { %v1334_v0 = vadd.f32 %v1333_v62, %v1305_v22  ;;  %v1420_v62 = vperm.slane %v86_v59, 0 }
 0xb19   :  { %v1337_v29 = vadd.f32 %v1334_v0, %v2089_v48  ;;  %v76_v48 = vld [vmem:[#allocation5 + $0x40] sm:$0xff] }
 0xb1a   :  { %1407 = vmatpush.msrb.mxu0 %v76_v48 }
 0xb1b   :  { %v1341_v58 = vsel %vm89_vm0, %v1337_v29, 0.0 }
 0xb1c   :  { %1342 = vadd.xlane.f32.xlu1 %v1341_v58  ;;  %1408 = vmatpush.msrb.mxu0 %v75_v12 }
 0xb1e   :  { %1409 = vmatpush.msrb.mxu0 %v74_v23 }
 0xb20   :  { %1410 = vmatpush.msrb.mxu0 %v73_v61 }
 0xb87   :  { %v1340_v1 = vpop.xlane.xlu0 %1339 }
 0xb88   :  { %v1344_v2 = vmul.f32 %v1340_v1, %v2073_v4 }
 0xb8a   :  { %v1346_v15 = vsub.f32 %v1336_v57, %v1344_v2 }
 0xb8c   :  { %v1348_v5 = vmul.f32 %v1346_v15, %v1346_v15 }
 0xb8e   :  { %v1350_v3 = vsel %vm89_vm0, %v1348_v5, 0.0 }
 0xb8f   :  { %v1343_v7 = vpop.xlane.xlu1 %1342  ;;  %1351 = vadd.xlane.f32.xlu2 %v1350_v3 }
 0xb90   :  { %v1345_v43 = vmul.f32 %v1343_v7, %v2073_v4 }
 0xb92   :  { %v1347_v9 = vsub.f32 %v1337_v29, %v1345_v43 }
 0xb94   :  { %v1349_v10 = vmul.f32 %v1347_v9, %v1347_v9 }
 0xb96   :  { %v1353_v8 = vsel %vm89_vm0, %v1349_v10, 0.0 }
 0xb97   :  { %1354 = vadd.xlane.f32.xlu0 %v1353_v8 }
 0xc02   :  { %v1352_v14 = vpop.xlane.xlu2 %1351 }
 0xc03   :  { %v1356_v16 = vmul.f32 %v1352_v14, %v2073_v4 }
 0xc05   :  { %v1358_v54 = vadd.f32 1e-05, %v1356_v16 }
 0xc07   :  { %1730 = vrsqrt.f32 %v1358_v54  ;;  %vm1366_vm2 = vweird.f32 %v1358_v54 }
 0xc0a   :  { %v1355_v24 = vpop.xlane.xlu0 %1354 }
 0xc0b   :  { %v1357_v25 = vmul.f32 %v1355_v24, %v2073_v4 }
 0xc0d   :  { %v1731_v28 = vpop.eup %1730  ;;  %v1359_v11 = vadd.f32 1e-05, %v1357_v25 }
 0xc0e   :  { %v1361_v38 = vmul.f32 %v1731_v28, %v1358_v54  ;;  %vm1367_vm1 = vweird.f32 %v1731_v28 }
 0xc0f   :  { %1732 = vrsqrt.f32 %v1359_v11  ;;  %vm1368_vm9 = vmor %vm1366_vm2, %vm1367_vm1  ;;  %vm1376_vm14 = vweird.f32 %v1359_v11 }
 0xc10   :  { %v1362_v33 = vmul.f32 %v1731_v28, %v1361_v38 }
 0xc12   :  { %v1363_v34 = vmul.f32 0.5, %v1362_v33 }
 0xc14   :  { %v1364_v35 = vsub.f32 1.5, %v1363_v34 }
 0xc15   :  { %v1733_v39 = vpop.eup %1732 }
 0xc16   :  { %v1365_v63 = vmul.f32 %v1731_v28, %v1364_v35  ;;  %v1371_v40 = vmul.f32 %v1733_v39, %v1359_v11  ;;  %vm1377_vm13 = vweird.f32 %v1733_v39  ;;  %v1738_v35 = vld [vmem:[#allocation5 + $0x98] sm:$0xff] }
 0xc17   :  { %vm1378_vm15 = vmor %vm1376_vm14, %vm1377_vm13 }
 0xc18   :  { %v1369_v42 = vsel %vm1368_vm9, %v1731_v28, %v1365_v63  ;;  %v1372_v44 = vmul.f32 %v1733_v39, %v1371_v40 }
 0xc19   :  { %v1380_v45 = vmul.f32 %v1369_v42, %v1346_v15  ;;  %v1500_v42 = vperm.slane %v1738_v35, 5 }
 0xc1a   :  { %v1373_v46 = vmul.f32 0.5, %v1372_v44 }
 0xc1b   :  { %v1383_v21 = vmul.f32 %v1382_v41, %v1380_v45 }
 0xc1c   :  { %v1374_v47 = vsub.f32 1.5, %v1373_v46 }
 0xc1d   :  { %v1386_v13 = vadd.f32 %v1385_v6, %v1383_v21 }
 0xc1e   :  { %v1375_v60 = vmul.f32 %v1733_v39, %v1374_v47 }
 0xc1f   :  { %1583 = vmatmul.msk.f32.vlgmr.msrb.gmra.mxu0 %vm89_vm0, %v1386_v13 }
 0xc20   :  { %v1379_v17 = vsel %vm1378_vm15, %v1733_v39, %v1375_v60  ;;  %v1497_v39 = vperm.slane %v1738_v35, 2 }
 0xc21   :  { %v1381_v49 = vmul.f32 %v1379_v17, %v1347_v9 }
 0xc23   :  { %v1384_v36 = vmul.f32 %v1382_v41, %v1381_v49 }
 0xc25   :  { %v1387_v50 = vadd.f32 %v1385_v6, %v1384_v36 }
 0xc27   :  { %1584 = vmatmul.msk.f32.gmra.mxu0 %vm89_vm0, %v1387_v50 }
 0xc9c   :  { %v1412_v31 = vpop.f32.mrf.mxu0 }
 0xc9d   :  { %v1413_v32 = vadd.f32 %v1412_v31, %v1388_v30 }
 0xc9f   :  { %v1418_v22 = vmax.f32 %v1413_v32, 0.0 }
 0xca1   :  { %1585 = vmatmul.msk.f32.vlgmr.msra.gmra.mxu1 %vm1421_vm3, %v1418_v22 }
 0xca4   :  { %v1415_v55 = vpop.f32.mrf.mxu0 }
 0xca5   :  { %v1416_v56 = vadd.f32 %v1415_v55, %v1388_v30 }
 0xca7   :  { %v1419_v57 = vmax.f32 %v1416_v56, 0.0 }
 0xca9   :  { %1586 = vmatmul.msk.f32.gmra.mxu1 %vm1421_vm3, %v1419_v57 }
 0xd1e   :  { %v1445_v0 = vpop.f32.mrf.mxu1 }
 0xd1f   :  { %v1446_v29 = vadd.f32 %v1445_v0, %v1420_v62 }
 0xd21   :  { %v1451_v58 = vadd.f32 %v1446_v29, %v1386_v13 }
 0xd23   :  { %v1453_v1 = vsel %vm89_vm0, %v1451_v58, 0.0 }
 0xd24   :  { %1454 = vadd.xlane.f32.xlu1 %v1453_v1 }
 0xd26   :  { %v1448_v2 = vpop.f32.mrf.mxu1 }
 0xd27   :  { %v1449_v15 = vadd.f32 %v1448_v2, %v1420_v62 }
 0xd29   :  { %v1452_v5 = vadd.f32 %v1449_v15, %v1387_v50 }
 0xd2b   :  { %v1456_v3 = vsel %vm89_vm0, %v1452_v5, 0.0 }
 0xd2c   :  { %1457 = vadd.xlane.f32.xlu2 %v1456_v3 }
 0xd97   :  { %v1455_v7 = vpop.xlane.xlu1 %1454 }
 0xd98   :  { %v1459_v43 = vmul.f32 %v1455_v7, %v2073_v4 }
 0xd9a   :  { %v1461_v9 = vsub.f32 %v1451_v58, %v1459_v43 }
 0xd9c   :  { %v1463_v10 = vmul.f32 %v1461_v9, %v1461_v9 }
 0xd9e   :  { %v1465_v8 = vsel %vm89_vm0, %v1463_v10, 0.0 }
 0xd9f   :  { %1466 = vadd.xlane.f32.xlu0 %v1465_v8  ;;  %v1458_v48 = vpop.xlane.xlu2 %1457 }
 0xda0   :  { %v1460_v12 = vmul.f32 %v1458_v48, %v2073_v4 }
 0xda2   :  { %v1462_v23 = vsub.f32 %v1452_v5, %v1460_v12 }
 0xda4   :  { %v1464_v61 = vmul.f32 %v1462_v23, %v1462_v23 }
 0xda6   :  { %v1468_v14 = vsel %vm89_vm0, %v1464_v61, 0.0 }
 0xda7   :  { %1469 = vadd.xlane.f32.xlu1 %v1468_v14 }
 0xe12   :  { %v1467_v16 = vpop.xlane.xlu0 %1466 }
 0xe13   :  { %v1471_v54 = vmul.f32 %v1467_v16, %v2073_v4 }
 0xe15   :  { %v1473_v18 = vadd.f32 1e-05, %v1471_v54 }
 0xe17   :  { %1734 = vrsqrt.f32 %v1473_v18  ;;  %vm1481_vm5 = vweird.f32 %v1473_v18 }
 0xe1a   :  { %v1470_v19 = vpop.xlane.xlu1 %1469 }
 0xe1b   :  { %v1472_v20 = vmul.f32 %v1470_v19, %v2073_v4 }
 0xe1d   :  { %v1735_v24 = vpop.eup %1734  ;;  %v1474_v25 = vadd.f32 1e-05, %v1472_v20 }
 0xe1e   :  { %v1476_v26 = vmul.f32 %v1735_v24, %v1473_v18  ;;  %vm1482_vm4 = vweird.f32 %v1735_v24 }
 0xe1f   :  { %1736 = vrsqrt.f32 %v1474_v25  ;;  %vm1483_vm6 = vmor %vm1481_vm5, %vm1482_vm4  ;;  %vm1491_vm8 = vweird.f32 %v1474_v25 }
 0xe20   :  { %v1477_v28 = vmul.f32 %v1735_v24, %v1476_v26 }
 0xe22   :  { %v1478_v11 = vmul.f32 0.5, %v1477_v28 }
 0xe24   :  { %v1479_v37 = vsub.f32 1.5, %v1478_v11 }
 0xe25   :  { %v1737_v38 = vpop.eup %1736 }
 0xe26   :  { %v1480_v33 = vmul.f32 %v1735_v24, %v1479_v37  ;;  %v1486_v34 = vmul.f32 %v1737_v38, %v1474_v25  ;;  %vm1492_vm7 = vweird.f32 %v1737_v38 }
 0xe27   :  { %vm1493_vm10 = vmor %vm1491_vm8, %vm1492_vm7 }
 0xe28   :  { %v1484_v63 = vsel %vm1483_vm6, %v1735_v24, %v1480_v33  ;;  %v1487_v40 = vmul.f32 %v1737_v38, %v1486_v34 }
 0xe29   :  { %v1495_v41 = vmul.f32 %v1484_v63, %v1461_v9 }
 0xe2a   :  { %v1488_v4 = vmul.f32 0.5, %v1487_v40 }
 0xe2b   :  { %v1498_v44 = vmul.f32 %v1497_v39, %v1495_v41 }
 0xe2c   :  { %v1489_v45 = vsub.f32 1.5, %v1488_v4 }
 0xe2d   :  { %v1501_v6 = vadd.f32 %v1500_v42, %v1498_v44 }
 0xe2e   :  { %v1490_v46 = vmul.f32 %v1737_v38, %v1489_v45 }
 0xe2f   :  { %1503 = vst.msk [vmem:[#allocation7] sm:$0xff] %vm89_vm0, %v1501_v6 }
 0xe30   :  { %v1494_v21 = vsel %vm1493_vm10, %v1737_v38, %v1490_v46 }
 0xe31   :  { %v1496_v47 = vmul.f32 %v1494_v21, %v1462_v23 }
 0xe33   :  { %v1499_v13 = vmul.f32 %v1497_v39, %v1496_v47 }
 0xe35   :  { %v1502_v60 = vadd.f32 %v1500_v42, %v1499_v13 }
 0xe37   :  { %1504 = vst.msk [vmem:[#allocation7 + $0x8] sm:$0xff] %vm89_vm0, %v1502_v60 }
 0xe38   :  { %1517 = dma.vmem_to_hbm [thread:$0]  %s1510_s27, 256, %s1512_s30, [#allocation4], %s1818_s23, %s1818_s23, %s1819_s24  }
 0xe39   :  { %1815 = dma.done.wait [#allocation4], 256  }
 0xe3a   :  { %1816 = vsyncadd [#allocation4], 4294967040 }
 0xe3b   :  { %1522 = vsyncpa [#allocation3], 1 }
 0xe3c   :  { %1523 = vsyncpa [#allocation6], 1 }
 0xe3d   :  { %1524 = vsyncpa [#allocation4], 1 }

</bundles_post_ra>
